<compile_context>
chip_gen: v5e
topology: v5e:2x2
jax: 0.10.0
libtpu: 0.0.40
codegen_flags: <defaults>
</compile_context>

<pallas_src>
import functools

import jax
import jax.numpy as jnp
from jax.experimental import pallas as pl
from jax.experimental.pallas import tpu as pltpu


# ----------------------------------------------------------------------------
# Fused bottleneck kernel (one batch sample per grid step)
# ----------------------------------------------------------------------------
def _bottleneck_kernel(x_ref, w1_ref, b1_ref, w2_ref, b2_ref, mask_ref,
                       w3_ref, b3_ref, o_ref, y1p_ref, *, spatial, cardinality):
    D, H, W = spatial
    M = D * H * W
    mid = w1_ref.shape[0]
    cpg = mid // cardinality
    pad = H * W + W + 1                     # max |flat offset| of a 3x3x3 tap

    x_f32 = x_ref[0]                        # [Cin, M] f32 (also the residual)
    x_bf = x_f32.astype(jnp.bfloat16)

    # ---- conv1 (1x1x1) + folded BN1 + ReLU : MXU (bf16 in, f32 acc) --------
    y1 = jnp.dot(w1_ref[...], x_bf, preferred_element_type=jnp.float32)
    y1 = jnp.maximum(y1 + b1_ref[...], 0.0)                     # [mid, M] f32

    # ---- conv2 (3x3x3 grouped, pad=1, stride=1): in-kernel, no im2col ------
    # zero-padded y1 along the flattened spatial axis, kept in VMEM scratch
    y1p_ref[...] = jnp.zeros((mid, M + 2 * pad), jnp.float32)
    y1p_ref[:, pad:pad + M] = y1

    acc = jnp.zeros((mid, M), jnp.float32)
    t = 0
    for kd in range(3):
        for kh in range(3):
            for kw in range(3):
                off = (kd - 1) * H * W + (kh - 1) * W + (kw - 1)
                tap = y1p_ref[:, pad + off:pad + off + M]        # [mid, M]
                msk = mask_ref[t:t + 1, :]                       # [1, M]
                if cpg == 1:
                    # depthwise: per-channel scalar weight, pure VPU FMA
                    wcol = w2_ref[:, t:t + 1]                    # [mid, 1]
                    acc = acc + tap * (wcol * msk)
                else:
                    # general grouped conv: broadcast in-group input channel j
                    # to that group's output channels (exact grouped FLOPs).
                    tap_g = tap.reshape(cardinality, cpg, M)
                    for j in range(cpg):
                        tj = jnp.broadcast_to(
                            tap_g[:, j:j + 1, :],
                            (cardinality, cpg, M)).reshape(mid, M)
                        wcol = w2_ref[:, t * cpg + j:t * cpg + j + 1]
                        acc = acc + tj * (wcol * msk)
                t += 1
    y2 = jnp.maximum(acc + b2_ref[...], 0.0)                     # [mid, M] f32

    # ---- conv3 (1x1x1) + folded BN3 + identity residual + ReLU : MXU -------
    out = jnp.dot(w3_ref[...], y2.astype(jnp.bfloat16),
                  preferred_element_type=jnp.float32)            # [out_c, M]
    out = out + b3_ref[...] + x_f32
    o_ref[0] = jnp.maximum(out, 0.0).astype(o_ref.dtype)


# ----------------------------------------------------------------------------
# Wrapper: ResNeXtBottleneck forward (stride=1, downsample=None, eval-mode BN)
# ----------------------------------------------------------------------------
def resnext_bottleneck_forward(x, params, cardinality, stride=1, eps=1e-5):
    """x: [N, C, D, H, W] (PyTorch NCDHW). Returns NCDHW."""
    N, Cin, D, H, W = x.shape
    if stride != 1:
        raise NotImplementedError("only stride=1 with downsample=None is supported")

    w1, w2, w3 = params["w1"], params["w2"], params["w3"]
    mid = w1.shape[0]
    out_c = w3.shape[0]
    cpg = mid // cardinality
    assert Cin == out_c, "identity residual requires inplanes == planes * expansion"

    def fold(p):
        g, b, m, v = p
        s = g / jnp.sqrt(v + eps)
        return s, b - m * s

    s1, t1 = fold(params["bn1"])
    s2, t2 = fold(params["bn2"])
    s3, t3 = fold(params["bn3"])

    # BN scale folded into the conv weights; bias kept as a [C, 1] column.
    w1cf = (w1[:, :, 0, 0, 0] * s1[:, None]).astype(jnp.bfloat16)        # [mid, Cin]
    w2cf = (jnp.transpose(w2, (0, 2, 3, 4, 1)).reshape(mid, 27 * cpg)
            * s2[:, None]).astype(jnp.float32)                           # [mid, 27*cpg]
    w3cf = (w3[:, :, 0, 0, 0] * s3[:, None]).astype(jnp.bfloat16)        # [out_c, mid]
    b1 = t1[:, None].astype(jnp.float32)
    b2 = t2[:, None].astype(jnp.float32)
    b3 = t3[:, None].astype(jnp.float32)

    # Per-tap validity mask (zeroes contributions whose 3x3x3 neighbour falls
    # outside the volume); enables flat-shift taps with no 3-D padded tensor.
    d_i = jnp.arange(D)[:, None, None]
    h_i = jnp.arange(H)[None, :, None]
    w_i = jnp.arange(W)[None, None, :]
    rows = []
    for kd in range(3):
        for kh in range(3):
            for kw in range(3):
                ok = ((d_i + kd - 1 >= 0) & (d_i + kd - 1 < D)
                      & (h_i + kh - 1 >= 0) & (h_i + kh - 1 < H)
                      & (w_i + kw - 1 >= 0) & (w_i + kw - 1 < W))
                rows.append(ok.reshape(-1))
    mask = jnp.stack(rows).astype(jnp.float32)                           # [27, M]

    M = D * H * W
    x_cf = x.reshape(N, Cin, M)           # channels-first, spatially flat (free)

    kern = functools.partial(_bottleneck_kernel, spatial=(D, H, W),
                             cardinality=cardinality)

    flops = 2 * N * M * (Cin * mid + 27 * cpg * mid + mid * out_c)
    bytes_io = (x_cf.size * 4 + N * out_c * M * 4
                + w1cf.size * 2 + w2cf.size * 4 + w3cf.size * 2
                + (b1.size + b2.size + b3.size + mask.size) * 4)

    out = pl.pallas_call(
        kern,
        out_shape=jax.ShapeDtypeStruct((N, out_c, M), jnp.float32),
        grid_spec=pltpu.PrefetchScalarGridSpec(
            num_scalar_prefetch=0,
            grid=(N,),
            in_specs=[
                pl.BlockSpec((1, Cin, M), lambda n: (n, 0, 0)),          # x
                pl.BlockSpec((mid, Cin), lambda n: (0, 0)),              # w1 (bf16)
                pl.BlockSpec((mid, 1), lambda n: (0, 0)),                # b1
                pl.BlockSpec((mid, 27 * cpg), lambda n: (0, 0)),         # w2
                pl.BlockSpec((mid, 1), lambda n: (0, 0)),                # b2
                pl.BlockSpec((27, M), lambda n: (0, 0)),                 # tap mask
                pl.BlockSpec((out_c, mid), lambda n: (0, 0)),            # w3 (bf16)
                pl.BlockSpec((out_c, 1), lambda n: (0, 0)),              # b3
            ],
            out_specs=pl.BlockSpec((1, out_c, M), lambda n: (n, 0, 0)),
            scratch_shapes=[
                pltpu.VMEM((mid, M + 2 * (H * W + W + 1)), jnp.float32),
            ],
        ),
        compiler_params=pltpu.CompilerParams(
            dimension_semantics=("parallel",),
            vmem_limit_bytes=32 * 1024 * 1024),
        cost_estimate=pl.CostEstimate(flops=flops, transcendentals=0,
                                      bytes_accessed=bytes_io),
    )(x_cf, w1cf, b1, w2cf, b2, mask, w3cf, b3)

    return out.reshape(N, out_c, D, H, W)


# ----------------------------------------------------------------------------
# Deterministic parameter init (shapes follow the nn.Module __init__)
# ----------------------------------------------------------------------------
def init_params(key, inplanes, planes, cardinality, expansion=2):
    mid = cardinality * int(planes / 32)
    out_c = planes * expansion
    k1, k2, k3 = jax.random.split(key, 3)
    w1 = 0.1 * jax.random.normal(k1, (mid, inplanes, 1, 1, 1), jnp.float32)
    w2 = 0.1 * jax.random.normal(k2, (mid, mid // cardinality, 3, 3, 3), jnp.float32)
    w3 = 0.1 * jax.random.normal(k3, (out_c, mid, 1, 1, 1), jnp.float32)

    def bn(c, shift):
        i = jnp.arange(c, dtype=jnp.float32)
        gamma = 1.0 + 0.1 * jnp.cos(i + shift)
        beta = 0.05 * jnp.sin(i + shift)
        mean = 0.02 * jnp.sin(0.5 * i + shift)
        var = 1.0 + 0.1 * jnp.abs(jnp.sin(i + shift))
        return (gamma, beta, mean, var)

    return {
        "w1": w1, "w2": w2, "w3": w3,
        "bn1": bn(mid, 0.1), "bn2": bn(mid, 0.2), "bn3": bn(out_c, 0.3),
    }


# ----------------------------------------------------------------------------
# Pure-JAX reference (eval-mode BN) for a sanity check
# ----------------------------------------------------------------------------
def reference_forward(x, params, cardinality, stride=1, eps=1e-5):
    def bn(y, p):
        g, b, m, v = p
        shp = (1, -1, 1, 1, 1)
        return (y - m.reshape(shp)) / jnp.sqrt(v + eps).reshape(shp) * g.reshape(shp) + b.reshape(shp)

    dn = ("NCDHW", "OIDHW", "NCDHW")
    hi = jax.lax.Precision.HIGHEST
    out = jax.lax.conv_general_dilated(x, params["w1"], (1, 1, 1), "VALID",
                                       dimension_numbers=dn, precision=hi)
    out = jnp.maximum(bn(out, params["bn1"]), 0.0)
    out = jax.lax.conv_general_dilated(out, params["w2"], (stride,) * 3,
                                       [(1, 1)] * 3, dimension_numbers=dn,
                                       feature_group_count=cardinality, precision=hi)
    out = jnp.maximum(bn(out, params["bn2"]), 0.0)
    out = jax.lax.conv_general_dilated(out, params["w3"], (1, 1, 1), "VALID",
                                       dimension_numbers=dn, precision=hi)
    out = bn(out, params["bn3"]) + x
    return jnp.maximum(out, 0.0)


if __name__ == "__main__":
    # ResNeXtBottleneck(inplanes=64, planes=32, cardinality=4, stride=1, downsample=None)
    inplanes, planes, cardinality, stride = 64, 32, 4, 1
    key = jax.random.PRNGKey(0)
    kx, kp = jax.random.split(key)
    params = init_params(kp, inplanes, planes, cardinality)

    # x in PyTorch NCDHW layout
    x = jax.random.normal(kx, (2, inplanes, 4, 8, 8), jnp.float32)

    out = resnext_bottleneck_forward(x, params, cardinality, stride=stride)
    out = jax.block_until_ready(out)

    ref = jax.block_until_ready(reference_forward(x, params, cardinality, stride=stride))
    assert out.shape == ref.shape, (out.shape, ref.shape)
    # 2e-2 tolerance: kernel uses bf16 MXU operands (f32 accumulation) vs the
    # Precision.HIGHEST f32 reference.
    assert jnp.allclose(out, ref, rtol=2e-2, atol=2e-2), float(jnp.max(jnp.abs(out - ref)))

    print("KERNEL_OK")
</pallas_src>

<mosaic_0001>
module attributes {stable_mosaic.version = 11 : i64} {
  func.func @_bottleneck_kernel(%arg0: i32, %arg1: memref<1x64x256xf32, #tpu.memory_space<vmem>>, %arg2: memref<4x64xbf16, #tpu.memory_space<vmem>>, %arg3: memref<4x1xf32, #tpu.memory_space<vmem>>, %arg4: memref<4x27xf32, #tpu.memory_space<vmem>>, %arg5: memref<4x1xf32, #tpu.memory_space<vmem>>, %arg6: memref<27x256xf32, #tpu.memory_space<vmem>>, %arg7: memref<64x4xbf16, #tpu.memory_space<vmem>>, %arg8: memref<64x1xf32, #tpu.memory_space<vmem>>, %arg9: memref<1x64x256xf32, #tpu.memory_space<vmem>>, %arg10: memref<4x402xf32, #tpu.memory_space<vmem>>) attributes {dimension_semantics = [#tpu.dimension_semantics<parallel>], iteration_bounds = array<i64: 2>, scalar_prefetch = 0 : i64, scratch_operands = 1 : i64, tpu.core_type = #tpu.core_type<tc>, window_params = [{transform_indices = @transform_0, window_bounds = array<i64: 1, 64, 256>}, {pipeline_mode = #tpu.pipeline_mode<synchronous>, transform_indices = @transform_1, window_bounds = array<i64: 4, 64>}, {pipeline_mode = #tpu.pipeline_mode<synchronous>, transform_indices = @transform_2, window_bounds = array<i64: 4, 1>}, {pipeline_mode = #tpu.pipeline_mode<synchronous>, transform_indices = @transform_3, window_bounds = array<i64: 4, 27>}, {pipeline_mode = #tpu.pipeline_mode<synchronous>, transform_indices = @transform_4, window_bounds = array<i64: 4, 1>}, {pipeline_mode = #tpu.pipeline_mode<synchronous>, transform_indices = @transform_5, window_bounds = array<i64: 27, 256>}, {pipeline_mode = #tpu.pipeline_mode<synchronous>, transform_indices = @transform_6, window_bounds = array<i64: 64, 4>}, {pipeline_mode = #tpu.pipeline_mode<synchronous>, transform_indices = @transform_7, window_bounds = array<i64: 64, 1>}, {transform_indices = @transform_8, window_bounds = array<i64: 1, 64, 256>}]} {
    %c0 = arith.constant 0 : index
    %c0_0 = arith.constant 0 : index
    %c0_1 = arith.constant 0 : index
    %0 = vector.load %arg1[%c0, %c0_0, %c0_1] : memref<1x64x256xf32, #tpu.memory_space<vmem>>, vector<1x64x256xf32>
    %1 = vector.shape_cast %0 : vector<1x64x256xf32> to vector<64x256xf32>
    %2 = arith.truncf %1 : vector<64x256xf32> to vector<64x256xbf16>
    %c0_2 = arith.constant 0 : index
    %c0_3 = arith.constant 0 : index
    %3 = vector.load %arg2[%c0_2, %c0_3] : memref<4x64xbf16, #tpu.memory_space<vmem>>, vector<4x64xbf16>
    %cst = arith.constant dense<0.000000e+00> : vector<4x256xf32>
    %4 = tpu.matmul %3, %2, %cst {dimension_numbers = #tpu.dot_dimension_numbers<[1], [0], [0], [1], [0, 0, 1, 1], [], []>} : vector<4x64xbf16>, vector<64x256xbf16>, vector<4x256xf32> -> vector<4x256xf32>
    %c0_4 = arith.constant 0 : index
    %c0_5 = arith.constant 0 : index
    %5 = vector.load %arg3[%c0_4, %c0_5] : memref<4x1xf32, #tpu.memory_space<vmem>>, vector<4x1xf32>
    %6 = vector.broadcast %5 : vector<4x1xf32> to vector<4x256xf32>
    %7 = arith.addf %4, %6 : vector<4x256xf32>
    %cst_6 = arith.constant 0.000000e+00 : f32
    %8 = vector.broadcast %cst_6 : f32 to vector<4x256xf32>
    %9 = arith.maximumf %7, %8 : vector<4x256xf32>
    %cst_7 = arith.constant 0.000000e+00 : f32
    %10 = vector.broadcast %cst_7 : f32 to vector<4x402xf32>
    %c0_8 = arith.constant 0 : index
    %c0_9 = arith.constant 0 : index
    %11 = vector.load %arg10[%c0_8, %c0_9] : memref<4x402xf32, #tpu.memory_space<vmem>>, vector<4x402xf32>
    tpu.vector_store %arg10[%c0_8, %c0_9], %10 {strides = array<i32>} : memref<4x402xf32, #tpu.memory_space<vmem>>, vector<4x402xf32>,
    %c0_10 = arith.constant 0 : index
    %c73 = arith.constant 73 : index
    %12 = vector.load %arg10[%c0_10, %c73] : memref<4x402xf32, #tpu.memory_space<vmem>>, vector<4x256xf32>
    tpu.vector_store %arg10[%c0_10, %c73], %9 {strides = array<i32>} : memref<4x402xf32, #tpu.memory_space<vmem>>, vector<4x256xf32>,
    %cst_11 = arith.constant 0.000000e+00 : f32
    %13 = vector.broadcast %cst_11 : f32 to vector<4x256xf32>
    %c0_12 = arith.constant 0 : index
    %c0_13 = arith.constant 0 : index
    %14 = vector.load %arg10[%c0_12, %c0_13] : memref<4x402xf32, #tpu.memory_space<vmem>>, vector<4x256xf32>
    %c0_14 = arith.constant 0 : index
    %c0_15 = arith.constant 0 : index
    %15 = vector.load %arg6[%c0_14, %c0_15] : memref<27x256xf32, #tpu.memory_space<vmem>>, vector<1x256xf32>
    %c0_16 = arith.constant 0 : index
    %c0_17 = arith.constant 0 : index
    %16 = vector.load %arg4[%c0_16, %c0_17] : memref<4x27xf32, #tpu.memory_space<vmem>>, vector<4x1xf32>
    %17 = vector.broadcast %16 : vector<4x1xf32> to vector<4x256xf32>
    %18 = vector.broadcast %15 : vector<1x256xf32> to vector<4x256xf32>
    %19 = arith.mulf %17, %18 : vector<4x256xf32>
    %20 = arith.mulf %14, %19 : vector<4x256xf32>
    %21 = arith.addf %13, %20 : vector<4x256xf32>
    %c0_18 = arith.constant 0 : index
    %c1 = arith.constant 1 : index
    %22 = vector.load %arg10[%c0_18, %c1] : memref<4x402xf32, #tpu.memory_space<vmem>>, vector<4x256xf32>
    %c1_19 = arith.constant 1 : index
    %c0_20 = arith.constant 0 : index
    %23 = vector.load %arg6[%c1_19, %c0_20] : memref<27x256xf32, #tpu.memory_space<vmem>>, vector<1x256xf32>
    %c0_21 = arith.constant 0 : index
    %c1_22 = arith.constant 1 : index
    %24 = vector.load %arg4[%c0_21, %c1_22] : memref<4x27xf32, #tpu.memory_space<vmem>>, vector<4x1xf32>
    %25 = vector.broadcast %24 : vector<4x1xf32> to vector<4x256xf32>
    %26 = vector.broadcast %23 : vector<1x256xf32> to vector<4x256xf32>
    %27 = arith.mulf %25, %26 : vector<4x256xf32>
    %28 = arith.mulf %22, %27 : vector<4x256xf32>
    %29 = arith.addf %21, %28 : vector<4x256xf32>
    %c0_23 = arith.constant 0 : index
    %c2 = arith.constant 2 : index
    %30 = vector.load %arg10[%c0_23, %c2] : memref<4x402xf32, #tpu.memory_space<vmem>>, vector<4x256xf32>
    %c2_24 = arith.constant 2 : index
    %c0_25 = arith.constant 0 : index
    %31 = vector.load %arg6[%c2_24, %c0_25] : memref<27x256xf32, #tpu.memory_space<vmem>>, vector<1x256xf32>
    %c0_26 = arith.constant 0 : index
    %c2_27 = arith.constant 2 : index
    %32 = vector.load %arg4[%c0_26, %c2_27] : memref<4x27xf32, #tpu.memory_space<vmem>>, vector<4x1xf32>
    %33 = vector.broadcast %32 : vector<4x1xf32> to vector<4x256xf32>
    %34 = vector.broadcast %31 : vector<1x256xf32> to vector<4x256xf32>
    %35 = arith.mulf %33, %34 : vector<4x256xf32>
    %36 = arith.mulf %30, %35 : vector<4x256xf32>
    %37 = arith.addf %29, %36 : vector<4x256xf32>
    %c0_28 = arith.constant 0 : index
    %c8 = arith.constant 8 : index
    %38 = vector.load %arg10[%c0_28, %c8] : memref<4x402xf32, #tpu.memory_space<vmem>>, vector<4x256xf32>
    %c3 = arith.constant 3 : index
    %c0_29 = arith.constant 0 : index
    %39 = vector.load %arg6[%c3, %c0_29] : memref<27x256xf32, #tpu.memory_space<vmem>>, vector<1x256xf32>
    %c0_30 = arith.constant 0 : index
    %c3_31 = arith.constant 3 : index
    %40 = vector.load %arg4[%c0_30, %c3_31] : memref<4x27xf32, #tpu.memory_space<vmem>>, vector<4x1xf32>
    %41 = vector.broadcast %40 : vector<4x1xf32> to vector<4x256xf32>
    %42 = vector.broadcast %39 : vector<1x256xf32> to vector<4x256xf32>
    %43 = arith.mulf %41, %42 : vector<4x256xf32>
    %44 = arith.mulf %38, %43 : vector<4x256xf32>
    %45 = arith.addf %37, %44 : vector<4x256xf32>
    %c0_32 = arith.constant 0 : index
    %c9 = arith.constant 9 : index
    %46 = vector.load %arg10[%c0_32, %c9] : memref<4x402xf32, #tpu.memory_space<vmem>>, vector<4x256xf32>
    %c4 = arith.constant 4 : index
    %c0_33 = arith.constant 0 : index
    %47 = vector.load %arg6[%c4, %c0_33] : memref<27x256xf32, #tpu.memory_space<vmem>>, vector<1x256xf32>
    %c0_34 = arith.constant 0 : index
    %c4_35 = arith.constant 4 : index
    %48 = vector.load %arg4[%c0_34, %c4_35] : memref<4x27xf32, #tpu.memory_space<vmem>>, vector<4x1xf32>
    %49 = vector.broadcast %48 : vector<4x1xf32> to vector<4x256xf32>
    %50 = vector.broadcast %47 : vector<1x256xf32> to vector<4x256xf32>
    %51 = arith.mulf %49, %50 : vector<4x256xf32>
    %52 = arith.mulf %46, %51 : vector<4x256xf32>
    %53 = arith.addf %45, %52 : vector<4x256xf32>
    %c0_36 = arith.constant 0 : index
    %c10 = arith.constant 10 : index
    %54 = vector.load %arg10[%c0_36, %c10] : memref<4x402xf32, #tpu.memory_space<vmem>>, vector<4x256xf32>
    %c5 = arith.constant 5 : index
    %c0_37 = arith.constant 0 : index
    %55 = vector.load %arg6[%c5, %c0_37] : memref<27x256xf32, #tpu.memory_space<vmem>>, vector<1x256xf32>
    %c0_38 = arith.constant 0 : index
    %c5_39 = arith.constant 5 : index
    %56 = vector.load %arg4[%c0_38, %c5_39] : memref<4x27xf32, #tpu.memory_space<vmem>>, vector<4x1xf32>
    %57 = vector.broadcast %56 : vector<4x1xf32> to vector<4x256xf32>
    %58 = vector.broadcast %55 : vector<1x256xf32> to vector<4x256xf32>
    %59 = arith.mulf %57, %58 : vector<4x256xf32>
    %60 = arith.mulf %54, %59 : vector<4x256xf32>
    %61 = arith.addf %53, %60 : vector<4x256xf32>
    %c0_40 = arith.constant 0 : index
    %c16 = arith.constant 16 : index
    %62 = vector.load %arg10[%c0_40, %c16] : memref<4x402xf32, #tpu.memory_space<vmem>>, vector<4x256xf32>
    %c6 = arith.constant 6 : index
    %c0_41 = arith.constant 0 : index
    %63 = vector.load %arg6[%c6, %c0_41] : memref<27x256xf32, #tpu.memory_space<vmem>>, vector<1x256xf32>
    %c0_42 = arith.constant 0 : index
    %c6_43 = arith.constant 6 : index
    %64 = vector.load %arg4[%c0_42, %c6_43] : memref<4x27xf32, #tpu.memory_space<vmem>>, vector<4x1xf32>
    %65 = vector.broadcast %64 : vector<4x1xf32> to vector<4x256xf32>
    %66 = vector.broadcast %63 : vector<1x256xf32> to vector<4x256xf32>
    %67 = arith.mulf %65, %66 : vector<4x256xf32>
    %68 = arith.mulf %62, %67 : vector<4x256xf32>
    %69 = arith.addf %61, %68 : vector<4x256xf32>
    %c0_44 = arith.constant 0 : index
    %c17 = arith.constant 17 : index
    %70 = vector.load %arg10[%c0_44, %c17] : memref<4x402xf32, #tpu.memory_space<vmem>>, vector<4x256xf32>
    %c7 = arith.constant 7 : index
    %c0_45 = arith.constant 0 : index
    %71 = vector.load %arg6[%c7, %c0_45] : memref<27x256xf32, #tpu.memory_space<vmem>>, vector<1x256xf32>
    %c0_46 = arith.constant 0 : index
    %c7_47 = arith.constant 7 : index
    %72 = vector.load %arg4[%c0_46, %c7_47] : memref<4x27xf32, #tpu.memory_space<vmem>>, vector<4x1xf32>
    %73 = vector.broadcast %72 : vector<4x1xf32> to vector<4x256xf32>
    %74 = vector.broadcast %71 : vector<1x256xf32> to vector<4x256xf32>
    %75 = arith.mulf %73, %74 : vector<4x256xf32>
    %76 = arith.mulf %70, %75 : vector<4x256xf32>
    %77 = arith.addf %69, %76 : vector<4x256xf32>
    %c0_48 = arith.constant 0 : index
    %c18 = arith.constant 18 : index
    %78 = vector.load %arg10[%c0_48, %c18] : memref<4x402xf32, #tpu.memory_space<vmem>>, vector<4x256xf32>
    %c8_49 = arith.constant 8 : index
    %c0_50 = arith.constant 0 : index
    %79 = vector.load %arg6[%c8_49, %c0_50] : memref<27x256xf32, #tpu.memory_space<vmem>>, vector<1x256xf32>
    %c0_51 = arith.constant 0 : index
    %c8_52 = arith.constant 8 : index
    %80 = vector.load %arg4[%c0_51, %c8_52] : memref<4x27xf32, #tpu.memory_space<vmem>>, vector<4x1xf32>
    %81 = vector.broadcast %80 : vector<4x1xf32> to vector<4x256xf32>
    %82 = vector.broadcast %79 : vector<1x256xf32> to vector<4x256xf32>
    %83 = arith.mulf %81, %82 : vector<4x256xf32>
    %84 = arith.mulf %78, %83 : vector<4x256xf32>
    %85 = arith.addf %77, %84 : vector<4x256xf32>
    %c0_53 = arith.constant 0 : index
    %c64 = arith.constant 64 : index
    %86 = vector.load %arg10[%c0_53, %c64] : memref<4x402xf32, #tpu.memory_space<vmem>>, vector<4x256xf32>
    %c9_54 = arith.constant 9 : index
    %c0_55 = arith.constant 0 : index
    %87 = vector.load %arg6[%c9_54, %c0_55] : memref<27x256xf32, #tpu.memory_space<vmem>>, vector<1x256xf32>
    %c0_56 = arith.constant 0 : index
    %c9_57 = arith.constant 9 : index
    %88 = vector.load %arg4[%c0_56, %c9_57] : memref<4x27xf32, #tpu.memory_space<vmem>>, vector<4x1xf32>
    %89 = vector.broadcast %88 : vector<4x1xf32> to vector<4x256xf32>
    %90 = vector.broadcast %87 : vector<1x256xf32> to vector<4x256xf32>
    %91 = arith.mulf %89, %90 : vector<4x256xf32>
    %92 = arith.mulf %86, %91 : vector<4x256xf32>
    %93 = arith.addf %85, %92 : vector<4x256xf32>
    %c0_58 = arith.constant 0 : index
    %c65 = arith.constant 65 : index
    %94 = vector.load %arg10[%c0_58, %c65] : memref<4x402xf32, #tpu.memory_space<vmem>>, vector<4x256xf32>
    %c10_59 = arith.constant 10 : index
    %c0_60 = arith.constant 0 : index
    %95 = vector.load %arg6[%c10_59, %c0_60] : memref<27x256xf32, #tpu.memory_space<vmem>>, vector<1x256xf32>
    %c0_61 = arith.constant 0 : index
    %c10_62 = arith.constant 10 : index
    %96 = vector.load %arg4[%c0_61, %c10_62] : memref<4x27xf32, #tpu.memory_space<vmem>>, vector<4x1xf32>
    %97 = vector.broadcast %96 : vector<4x1xf32> to vector<4x256xf32>
    %98 = vector.broadcast %95 : vector<1x256xf32> to vector<4x256xf32>
    %99 = arith.mulf %97, %98 : vector<4x256xf32>
    %100 = arith.mulf %94, %99 : vector<4x256xf32>
    %101 = arith.addf %93, %100 : vector<4x256xf32>
    %c0_63 = arith.constant 0 : index
    %c66 = arith.constant 66 : index
    %102 = vector.load %arg10[%c0_63, %c66] : memref<4x402xf32, #tpu.memory_space<vmem>>, vector<4x256xf32>
    %c11 = arith.constant 11 : index
    %c0_64 = arith.constant 0 : index
    %103 = vector.load %arg6[%c11, %c0_64] : memref<27x256xf32, #tpu.memory_space<vmem>>, vector<1x256xf32>
    %c0_65 = arith.constant 0 : index
    %c11_66 = arith.constant 11 : index
    %104 = vector.load %arg4[%c0_65, %c11_66] : memref<4x27xf32, #tpu.memory_space<vmem>>, vector<4x1xf32>
    %105 = vector.broadcast %104 : vector<4x1xf32> to vector<4x256xf32>
    %106 = vector.broadcast %103 : vector<1x256xf32> to vector<4x256xf32>
    %107 = arith.mulf %105, %106 : vector<4x256xf32>
    %108 = arith.mulf %102, %107 : vector<4x256xf32>
    %109 = arith.addf %101, %108 : vector<4x256xf32>
    %c0_67 = arith.constant 0 : index
    %c72 = arith.constant 72 : index
    %110 = vector.load %arg10[%c0_67, %c72] : memref<4x402xf32, #tpu.memory_space<vmem>>, vector<4x256xf32>
    %c12 = arith.constant 12 : index
    %c0_68 = arith.constant 0 : index
    %111 = vector.load %arg6[%c12, %c0_68] : memref<27x256xf32, #tpu.memory_space<vmem>>, vector<1x256xf32>
    %c0_69 = arith.constant 0 : index
    %c12_70 = arith.constant 12 : index
    %112 = vector.load %arg4[%c0_69, %c12_70] : memref<4x27xf32, #tpu.memory_space<vmem>>, vector<4x1xf32>
    %113 = vector.broadcast %112 : vector<4x1xf32> to vector<4x256xf32>
    %114 = vector.broadcast %111 : vector<1x256xf32> to vector<4x256xf32>
    %115 = arith.mulf %113, %114 : vector<4x256xf32>
    %116 = arith.mulf %110, %115 : vector<4x256xf32>
    %117 = arith.addf %109, %116 : vector<4x256xf32>
    %c0_71 = arith.constant 0 : index
    %c73_72 = arith.constant 73 : index
    %118 = vector.load %arg10[%c0_71, %c73_72] : memref<4x402xf32, #tpu.memory_space<vmem>>, vector<4x256xf32>
    %c13 = arith.constant 13 : index
    %c0_73 = arith.constant 0 : index
    %119 = vector.load %arg6[%c13, %c0_73] : memref<27x256xf32, #tpu.memory_space<vmem>>, vector<1x256xf32>
    %c0_74 = arith.constant 0 : index
    %c13_75 = arith.constant 13 : index
    %120 = vector.load %arg4[%c0_74, %c13_75] : memref<4x27xf32, #tpu.memory_space<vmem>>, vector<4x1xf32>
    %121 = vector.broadcast %120 : vector<4x1xf32> to vector<4x256xf32>
    %122 = vector.broadcast %119 : vector<1x256xf32> to vector<4x256xf32>
    %123 = arith.mulf %121, %122 : vector<4x256xf32>
    %124 = arith.mulf %118, %123 : vector<4x256xf32>
    %125 = arith.addf %117, %124 : vector<4x256xf32>
    %c0_76 = arith.constant 0 : index
    %c74 = arith.constant 74 : index
    %126 = vector.load %arg10[%c0_76, %c74] : memref<4x402xf32, #tpu.memory_space<vmem>>, vector<4x256xf32>
    %c14 = arith.constant 14 : index
    %c0_77 = arith.constant 0 : index
    %127 = vector.load %arg6[%c14, %c0_77] : memref<27x256xf32, #tpu.memory_space<vmem>>, vector<1x256xf32>
    %c0_78 = arith.constant 0 : index
    %c14_79 = arith.constant 14 : index
    %128 = vector.load %arg4[%c0_78, %c14_79] : memref<4x27xf32, #tpu.memory_space<vmem>>, vector<4x1xf32>
    %129 = vector.broadcast %128 : vector<4x1xf32> to vector<4x256xf32>
    %130 = vector.broadcast %127 : vector<1x256xf32> to vector<4x256xf32>
    %131 = arith.mulf %129, %130 : vector<4x256xf32>
    %132 = arith.mulf %126, %131 : vector<4x256xf32>
    %133 = arith.addf %125, %132 : vector<4x256xf32>
    %c0_80 = arith.constant 0 : index
    %c80 = arith.constant 80 : index
    %134 = vector.load %arg10[%c0_80, %c80] : memref<4x402xf32, #tpu.memory_space<vmem>>, vector<4x256xf32>
    %c15 = arith.constant 15 : index
    %c0_81 = arith.constant 0 : index
    %135 = vector.load %arg6[%c15, %c0_81] : memref<27x256xf32, #tpu.memory_space<vmem>>, vector<1x256xf32>
    %c0_82 = arith.constant 0 : index
    %c15_83 = arith.constant 15 : index
    %136 = vector.load %arg4[%c0_82, %c15_83] : memref<4x27xf32, #tpu.memory_space<vmem>>, vector<4x1xf32>
    %137 = vector.broadcast %136 : vector<4x1xf32> to vector<4x256xf32>
    %138 = vector.broadcast %135 : vector<1x256xf32> to vector<4x256xf32>
    %139 = arith.mulf %137, %138 : vector<4x256xf32>
    %140 = arith.mulf %134, %139 : vector<4x256xf32>
    %141 = arith.addf %133, %140 : vector<4x256xf32>
    %c0_84 = arith.constant 0 : index
    %c81 = arith.constant 81 : index
    %142 = vector.load %arg10[%c0_84, %c81] : memref<4x402xf32, #tpu.memory_space<vmem>>, vector<4x256xf32>
    %c16_85 = arith.constant 16 : index
    %c0_86 = arith.constant 0 : index
    %143 = vector.load %arg6[%c16_85, %c0_86] : memref<27x256xf32, #tpu.memory_space<vmem>>, vector<1x256xf32>
    %c0_87 = arith.constant 0 : index
    %c16_88 = arith.constant 16 : index
    %144 = vector.load %arg4[%c0_87, %c16_88] : memref<4x27xf32, #tpu.memory_space<vmem>>, vector<4x1xf32>
    %145 = vector.broadcast %144 : vector<4x1xf32> to vector<4x256xf32>
    %146 = vector.broadcast %143 : vector<1x256xf32> to vector<4x256xf32>
    %147 = arith.mulf %145, %146 : vector<4x256xf32>
    %148 = arith.mulf %142, %147 : vector<4x256xf32>
    %149 = arith.addf %141, %148 : vector<4x256xf32>
    %c0_89 = arith.constant 0 : index
    %c82 = arith.constant 82 : index
    %150 = vector.load %arg10[%c0_89, %c82] : memref<4x402xf32, #tpu.memory_space<vmem>>, vector<4x256xf32>
    %c17_90 = arith.constant 17 : index
    %c0_91 = arith.constant 0 : index
    %151 = vector.load %arg6[%c17_90, %c0_91] : memref<27x256xf32, #tpu.memory_space<vmem>>, vector<1x256xf32>
    %c0_92 = arith.constant 0 : index
    %c17_93 = arith.constant 17 : index
    %152 = vector.load %arg4[%c0_92, %c17_93] : memref<4x27xf32, #tpu.memory_space<vmem>>, vector<4x1xf32>
    %153 = vector.broadcast %152 : vector<4x1xf32> to vector<4x256xf32>
    %154 = vector.broadcast %151 : vector<1x256xf32> to vector<4x256xf32>
    %155 = arith.mulf %153, %154 : vector<4x256xf32>
    %156 = arith.mulf %150, %155 : vector<4x256xf32>
    %157 = arith.addf %149, %156 : vector<4x256xf32>
    %c0_94 = arith.constant 0 : index
    %c128 = arith.constant 128 : index
    %158 = vector.load %arg10[%c0_94, %c128] : memref<4x402xf32, #tpu.memory_space<vmem>>, vector<4x256xf32>
    %c18_95 = arith.constant 18 : index
    %c0_96 = arith.constant 0 : index
    %159 = vector.load %arg6[%c18_95, %c0_96] : memref<27x256xf32, #tpu.memory_space<vmem>>, vector<1x256xf32>
    %c0_97 = arith.constant 0 : index
    %c18_98 = arith.constant 18 : index
    %160 = vector.load %arg4[%c0_97, %c18_98] : memref<4x27xf32, #tpu.memory_space<vmem>>, vector<4x1xf32>
    %161 = vector.broadcast %160 : vector<4x1xf32> to vector<4x256xf32>
    %162 = vector.broadcast %159 : vector<1x256xf32> to vector<4x256xf32>
    %163 = arith.mulf %161, %162 : vector<4x256xf32>
    %164 = arith.mulf %158, %163 : vector<4x256xf32>
    %165 = arith.addf %157, %164 : vector<4x256xf32>
    %c0_99 = arith.constant 0 : index
    %c129 = arith.constant 129 : index
    %166 = vector.load %arg10[%c0_99, %c129] : memref<4x402xf32, #tpu.memory_space<vmem>>, vector<4x256xf32>
    %c19 = arith.constant 19 : index
    %c0_100 = arith.constant 0 : index
    %167 = vector.load %arg6[%c19, %c0_100] : memref<27x256xf32, #tpu.memory_space<vmem>>, vector<1x256xf32>
    %c0_101 = arith.constant 0 : index
    %c19_102 = arith.constant 19 : index
    %168 = vector.load %arg4[%c0_101, %c19_102] : memref<4x27xf32, #tpu.memory_space<vmem>>, vector<4x1xf32>
    %169 = vector.broadcast %168 : vector<4x1xf32> to vector<4x256xf32>
    %170 = vector.broadcast %167 : vector<1x256xf32> to vector<4x256xf32>
    %171 = arith.mulf %169, %170 : vector<4x256xf32>
    %172 = arith.mulf %166, %171 : vector<4x256xf32>
    %173 = arith.addf %165, %172 : vector<4x256xf32>
    %c0_103 = arith.constant 0 : index
    %c130 = arith.constant 130 : index
    %174 = vector.load %arg10[%c0_103, %c130] : memref<4x402xf32, #tpu.memory_space<vmem>>, vector<4x256xf32>
    %c20 = arith.constant 20 : index
    %c0_104 = arith.constant 0 : index
    %175 = vector.load %arg6[%c20, %c0_104] : memref<27x256xf32, #tpu.memory_space<vmem>>, vector<1x256xf32>
    %c0_105 = arith.constant 0 : index
    %c20_106 = arith.constant 20 : index
    %176 = vector.load %arg4[%c0_105, %c20_106] : memref<4x27xf32, #tpu.memory_space<vmem>>, vector<4x1xf32>
    %177 = vector.broadcast %176 : vector<4x1xf32> to vector<4x256xf32>
    %178 = vector.broadcast %175 : vector<1x256xf32> to vector<4x256xf32>
    %179 = arith.mulf %177, %178 : vector<4x256xf32>
    %180 = arith.mulf %174, %179 : vector<4x256xf32>
    %181 = arith.addf %173, %180 : vector<4x256xf32>
    %c0_107 = arith.constant 0 : index
    %c136 = arith.constant 136 : index
    %182 = vector.load %arg10[%c0_107, %c136] : memref<4x402xf32, #tpu.memory_space<vmem>>, vector<4x256xf32>
    %c21 = arith.constant 21 : index
    %c0_108 = arith.constant 0 : index
    %183 = vector.load %arg6[%c21, %c0_108] : memref<27x256xf32, #tpu.memory_space<vmem>>, vector<1x256xf32>
    %c0_109 = arith.constant 0 : index
    %c21_110 = arith.constant 21 : index
    %184 = vector.load %arg4[%c0_109, %c21_110] : memref<4x27xf32, #tpu.memory_space<vmem>>, vector<4x1xf32>
    %185 = vector.broadcast %184 : vector<4x1xf32> to vector<4x256xf32>
    %186 = vector.broadcast %183 : vector<1x256xf32> to vector<4x256xf32>
    %187 = arith.mulf %185, %186 : vector<4x256xf32>
    %188 = arith.mulf %182, %187 : vector<4x256xf32>
    %189 = arith.addf %181, %188 : vector<4x256xf32>
    %c0_111 = arith.constant 0 : index
    %c137 = arith.constant 137 : index
    %190 = vector.load %arg10[%c0_111, %c137] : memref<4x402xf32, #tpu.memory_space<vmem>>, vector<4x256xf32>
    %c22 = arith.constant 22 : index
    %c0_112 = arith.constant 0 : index
    %191 = vector.load %arg6[%c22, %c0_112] : memref<27x256xf32, #tpu.memory_space<vmem>>, vector<1x256xf32>
    %c0_113 = arith.constant 0 : index
    %c22_114 = arith.constant 22 : index
    %192 = vector.load %arg4[%c0_113, %c22_114] : memref<4x27xf32, #tpu.memory_space<vmem>>, vector<4x1xf32>
    %193 = vector.broadcast %192 : vector<4x1xf32> to vector<4x256xf32>
    %194 = vector.broadcast %191 : vector<1x256xf32> to vector<4x256xf32>
    %195 = arith.mulf %193, %194 : vector<4x256xf32>
    %196 = arith.mulf %190, %195 : vector<4x256xf32>
    %197 = arith.addf %189, %196 : vector<4x256xf32>
    %c0_115 = arith.constant 0 : index
    %c138 = arith.constant 138 : index
    %198 = vector.load %arg10[%c0_115, %c138] : memref<4x402xf32, #tpu.memory_space<vmem>>, vector<4x256xf32>
    %c23 = arith.constant 23 : index
    %c0_116 = arith.constant 0 : index
    %199 = vector.load %arg6[%c23, %c0_116] : memref<27x256xf32, #tpu.memory_space<vmem>>, vector<1x256xf32>
    %c0_117 = arith.constant 0 : index
    %c23_118 = arith.constant 23 : index
    %200 = vector.load %arg4[%c0_117, %c23_118] : memref<4x27xf32, #tpu.memory_space<vmem>>, vector<4x1xf32>
    %201 = vector.broadcast %200 : vector<4x1xf32> to vector<4x256xf32>
    %202 = vector.broadcast %199 : vector<1x256xf32> to vector<4x256xf32>
    %203 = arith.mulf %201, %202 : vector<4x256xf32>
    %204 = arith.mulf %198, %203 : vector<4x256xf32>
    %205 = arith.addf %197, %204 : vector<4x256xf32>
    %c0_119 = arith.constant 0 : index
    %c144 = arith.constant 144 : index
    %206 = vector.load %arg10[%c0_119, %c144] : memref<4x402xf32, #tpu.memory_space<vmem>>, vector<4x256xf32>
    %c24 = arith.constant 24 : index
    %c0_120 = arith.constant 0 : index
    %207 = vector.load %arg6[%c24, %c0_120] : memref<27x256xf32, #tpu.memory_space<vmem>>, vector<1x256xf32>
    %c0_121 = arith.constant 0 : index
    %c24_122 = arith.constant 24 : index
    %208 = vector.load %arg4[%c0_121, %c24_122] : memref<4x27xf32, #tpu.memory_space<vmem>>, vector<4x1xf32>
    %209 = vector.broadcast %208 : vector<4x1xf32> to vector<4x256xf32>
    %210 = vector.broadcast %207 : vector<1x256xf32> to vector<4x256xf32>
    %211 = arith.mulf %209, %210 : vector<4x256xf32>
    %212 = arith.mulf %206, %211 : vector<4x256xf32>
    %213 = arith.addf %205, %212 : vector<4x256xf32>
    %c0_123 = arith.constant 0 : index
    %c145 = arith.constant 145 : index
    %214 = vector.load %arg10[%c0_123, %c145] : memref<4x402xf32, #tpu.memory_space<vmem>>, vector<4x256xf32>
    %c25 = arith.constant 25 : index
    %c0_124 = arith.constant 0 : index
    %215 = vector.load %arg6[%c25, %c0_124] : memref<27x256xf32, #tpu.memory_space<vmem>>, vector<1x256xf32>
    %c0_125 = arith.constant 0 : index
    %c25_126 = arith.constant 25 : index
    %216 = vector.load %arg4[%c0_125, %c25_126] : memref<4x27xf32, #tpu.memory_space<vmem>>, vector<4x1xf32>
    %217 = vector.broadcast %216 : vector<4x1xf32> to vector<4x256xf32>
    %218 = vector.broadcast %215 : vector<1x256xf32> to vector<4x256xf32>
    %219 = arith.mulf %217, %218 : vector<4x256xf32>
    %220 = arith.mulf %214, %219 : vector<4x256xf32>
    %221 = arith.addf %213, %220 : vector<4x256xf32>
    %c0_127 = arith.constant 0 : index
    %c146 = arith.constant 146 : index
    %222 = vector.load %arg10[%c0_127, %c146] : memref<4x402xf32, #tpu.memory_space<vmem>>, vector<4x256xf32>
    %c26 = arith.constant 26 : index
    %c0_128 = arith.constant 0 : index
    %223 = vector.load %arg6[%c26, %c0_128] : memref<27x256xf32, #tpu.memory_space<vmem>>, vector<1x256xf32>
    %c0_129 = arith.constant 0 : index
    %c26_130 = arith.constant 26 : index
    %224 = vector.load %arg4[%c0_129, %c26_130] : memref<4x27xf32, #tpu.memory_space<vmem>>, vector<4x1xf32>
    %225 = vector.broadcast %224 : vector<4x1xf32> to vector<4x256xf32>
    %226 = vector.broadcast %223 : vector<1x256xf32> to vector<4x256xf32>
    %227 = arith.mulf %225, %226 : vector<4x256xf32>
    %228 = arith.mulf %222, %227 : vector<4x256xf32>
    %229 = arith.addf %221, %228 : vector<4x256xf32>
    %c0_131 = arith.constant 0 : index
    %c0_132 = arith.constant 0 : index
    %230 = vector.load %arg5[%c0_131, %c0_132] : memref<4x1xf32, #tpu.memory_space<vmem>>, vector<4x1xf32>
    %231 = vector.broadcast %230 : vector<4x1xf32> to vector<4x256xf32>
    %232 = arith.addf %229, %231 : vector<4x256xf32>
    %cst_133 = arith.constant 0.000000e+00 : f32
    %233 = vector.broadcast %cst_133 : f32 to vector<4x256xf32>
    %234 = arith.maximumf %232, %233 : vector<4x256xf32>
    %c0_134 = arith.constant 0 : index
    %c0_135 = arith.constant 0 : index
    %235 = vector.load %arg7[%c0_134, %c0_135] : memref<64x4xbf16, #tpu.memory_space<vmem>>, vector<64x4xbf16>
    %236 = arith.truncf %234 : vector<4x256xf32> to vector<4x256xbf16>
    %cst_136 = arith.constant dense<0.000000e+00> : vector<64x256xf32>
    %237 = tpu.matmul %235, %236, %cst_136 {dimension_numbers = #tpu.dot_dimension_numbers<[1], [0], [0], [1], [0, 0, 1, 1], [], []>} : vector<64x4xbf16>, vector<4x256xbf16>, vector<64x256xf32> -> vector<64x256xf32>
    %c0_137 = arith.constant 0 : index
    %c0_138 = arith.constant 0 : index
    %238 = vector.load %arg8[%c0_137, %c0_138] : memref<64x1xf32, #tpu.memory_space<vmem>>, vector<64x1xf32>
    %239 = vector.broadcast %238 : vector<64x1xf32> to vector<64x256xf32>
    %240 = arith.addf %237, %239 : vector<64x256xf32>
    %241 = arith.addf %240, %1 : vector<64x256xf32>
    %cst_139 = arith.constant 0.000000e+00 : f32
    %242 = vector.broadcast %cst_139 : f32 to vector<64x256xf32>
    %243 = arith.maximumf %241, %242 : vector<64x256xf32>
    %c0_140 = arith.constant 0 : index
    %c0_141 = arith.constant 0 : index
    %c0_142 = arith.constant 0 : index
    %244 = vector.load %arg9[%c0_140, %c0_141, %c0_142] : memref<1x64x256xf32, #tpu.memory_space<vmem>>, vector<1x64x256xf32>
    %245 = vector.shape_cast %244 : vector<1x64x256xf32> to vector<64x256xf32>
    %246 = vector.shape_cast %243 : vector<64x256xf32> to vector<1x64x256xf32>
    tpu.vector_store %arg9[%c0_140, %c0_141, %c0_142], %246 {strides = array<i32>} : memref<1x64x256xf32, #tpu.memory_space<vmem>>, vector<1x64x256xf32>,
    return
  }
  func.func @transform_0(%arg0: i32) -> (i32, i32, i32) {
    %c0_i32 = arith.constant 0 : i32
    %c0_i32_0 = arith.constant 0 : i32
    %c0_i32_1 = arith.constant 0 : i32
    return %arg0, %c0_i32, %c0_i32_0 : i32, i32, i32
  }
  func.func @transform_1(%arg0: i32) -> (i32, i32) {
    %c0_i32 = arith.constant 0 : i32
    %c0_i32_0 = arith.constant 0 : i32
    %c0_i32_1 = arith.constant 0 : i32
    return %c0_i32, %c0_i32_0 : i32, i32
  }
  func.func @transform_2(%arg0: i32) -> (i32, i32) {
    %c0_i32 = arith.constant 0 : i32
    %c0_i32_0 = arith.constant 0 : i32
    %c0_i32_1 = arith.constant 0 : i32
    return %c0_i32, %c0_i32_0 : i32, i32
  }
  func.func @transform_3(%arg0: i32) -> (i32, i32) {
    %c0_i32 = arith.constant 0 : i32
    %c0_i32_0 = arith.constant 0 : i32
    %c0_i32_1 = arith.constant 0 : i32
    return %c0_i32, %c0_i32_0 : i32, i32
  }
  func.func @transform_4(%arg0: i32) -> (i32, i32) {
    %c0_i32 = arith.constant 0 : i32
    %c0_i32_0 = arith.constant 0 : i32
    %c0_i32_1 = arith.constant 0 : i32
    return %c0_i32, %c0_i32_0 : i32, i32
  }
  func.func @transform_5(%arg0: i32) -> (i32, i32) {
    %c0_i32 = arith.constant 0 : i32
    %c0_i32_0 = arith.constant 0 : i32
    %c0_i32_1 = arith.constant 0 : i32
    return %c0_i32, %c0_i32_0 : i32, i32
  }
  func.func @transform_6(%arg0: i32) -> (i32, i32) {
    %c0_i32 = arith.constant 0 : i32
    %c0_i32_0 = arith.constant 0 : i32
    %c0_i32_1 = arith.constant 0 : i32
    return %c0_i32, %c0_i32_0 : i32, i32
  }
  func.func @transform_7(%arg0: i32) -> (i32, i32) {
    %c0_i32 = arith.constant 0 : i32
    %c0_i32_0 = arith.constant 0 : i32
    %c0_i32_1 = arith.constant 0 : i32
    return %c0_i32, %c0_i32_0 : i32, i32
  }
  func.func @transform_8(%arg0: i32) -> (i32, i32, i32) {
    %c0_i32 = arith.constant 0 : i32
    %c0_i32_0 = arith.constant 0 : i32
    %c0_i32_1 = arith.constant 0 : i32
    return %arg0, %c0_i32, %c0_i32_0 : i32, i32, i32
  }
}

</mosaic_0001>

<bundles_post_ra>
// kernel: tpu_custom_call.1
= control target key start
LH: loop header
LB: loop body
LE: loop exit
PB: predicated region body
PF: predicated region fallthrough
CT: control target
= control target key end

     0   :  { %13 = vsyncpa [#allocation4], 0  ;;  %s2941_s0 = inlined_call_operand.hbm [shape: f32[2,64,256], index: 0, kind: input, shape index: {}]   ;;  %s2942_s1 = inlined_call_operand.vmem [shape: bf16[4,64], index: 1, kind: input, shape index: {}]   ;;  %s2943_s2 = inlined_call_operand.vmem [shape: f32[4,1], index: 2, kind: input, shape index: {}]   ;;  %s2944_s3 = inlined_call_operand.vmem [shape: f32[4,27], index: 3, kind: input, shape index: {}]   ;;  %s2945_s4 = inlined_call_operand.vmem [shape: f32[4,1], index: 4, kind: input, shape index: {}]   ;;  %s2946_s5 = inlined_call_operand.vmem [shape: f32[27,256], index: 5, kind: input, shape index: {}]   ;;  %s2947_s6 = inlined_call_operand.vmem [shape: bf16[64,4], index: 6, kind: input, shape index: {}]   ;;  %s2948_s7 = inlined_call_operand.vmem [shape: f32[64,1], index: 7, kind: input, shape index: {}]   ;;  %s2949_s8 = inlined_call_operand.hbm [shape: f32[2,64,256], index: 8, kind: output, shape index: {}]  }
   0x1   :  { %15 = vsyncpa [#allocation4 + $0x1], 0 }
   0x2   :  { %16 = vsyncpa [#allocation5], 0 }
   0x3   :  { %18 = vsyncpa [#allocation5 + $0x1], 0  ;;  %s2166_s27 = smov 0   ;;  %s2168_s28 = smov 0  }
   0x4   :  { %s2170_s29 = smov 0   ;;  %s2172_s30 = smov 0  }
   0x5 LB: > { %2962 = sst [smem:[#allocation9_spill]] %s2050_s29  ;;  %s2187_s9 = sadd.s32 4294967295, %s2054_s30   ;;  %s2054_s30 = sphi %s2172_s30, %s2984_s30   ;;  %s2050_s29 = sphi %s2170_s29, %s2981_s29   ;;  %s2046_s28 = sphi %s2168_s28, %s2983_s28   ;;  %s2042_s27 = sphi %s2166_s27, %s2982_s27  }
   0x6   : > { %s1726_s10 = sadd.s32 4294967294, %s2054_s30   ;;  %s2191_s11 = sadd.s32 1, %s2054_s30  }
   0x7   : > { %s31_s12 = sadd.s32 1, %s2050_s29  ;;  %s28_s13 = ssub.s32 %s2054_s30, %s2191_s11 }
   0x8   : > { %p38_p0 = scmp.ne.s32.totalorder %s2050_s29, %s2046_s28  ;;  %p29_p1 = scmp.eq.s32.totalorder %s28_s13, 0 }
   0x9   : > { %p39_p2 = scmp.eq.s32.totalorder %s2054_s30, 0  ;;  %p44_p3 = scmp.ne.s32.totalorder %s2046_s28, %s2042_s27 }
   0xa   : > { %p45_p4 = scmp.eq.s32.totalorder %s2187_s9, 0  ;;  %p215_p7 = scmp.eq.s32.totalorder %s2187_s9, 1 }
   0xb   : > { %s2203_s14 = scalar_select %p29_p1, %s2050_s29, %s31_s12  }
   0xc   : > { %p2205_p5 = por %p39_p2, %p38_p0  ;;  %p2209_p6 = por %p45_p4, %p44_p3 }
   0xd   : > { %2963 = sst [smem:[#allocation10_spill]] %s2203_s14  ;;  %p221_p8 = scmp.eq.s32.totalorder %s1726_s10, 1 }
   0xe   : > { %p1812_p10 = scmp.lt.s32.totalorder %s2054_s30, 2  ;;  %p2216_p11 = por %p215_p7, %p38_p0 }
   0xf   : > { %p2220_p12 = por %p221_p8, %p44_p3  ;;  %s262_s19 = sand.u32 1, %s2050_s29  }
  0x10   : > { %s1792_s20 = sshll.u32 %s2054_s30, 7  ;;  %s1729_s21 = sshll.u32 %s262_s19, 7 }
  0x11   : > { %s271_s24 = scalar_lea.hbm %s2941_s0, %s1792_s20  ;;  %s266_s26 = scalar_lea.vmem [#allocation3], %s1729_s21 }
  0x12   : > { %s272_s25 = sshll.u32 %s271_s24, 4  ;;  %s274_s10 = sshll.u32 %s266_s26, 4  ;;  %s273_s25 = int_to_ptr.hbm [resolvable:$true] %s272_s25  ;;  %s275_s10 = int_to_ptr.vmem [resolvable:$true] %s274_s10 }
  0x13   : > { %p2231_p13 = pnand %p1812_p10, %p2205_p5  ;;  %p1732_p0 = scmp.ge.s32.totalorder %s2054_s30, 1 }
  0x14   : > { %p282_p1 = scmp.lt.s32.totalorder %s2054_s30, 3  ;;  %s263_s13 = scalar_lea.sflag [#allocation4], %s262_s19 }
  0x15   : > { %s1958_s14 = sshra.s32 %s273_s25, 4  ;;  %p1962_p3 = pneg %p2231_p13  ;;  %s1959_s14 = int_to_ptr.hbm [resolvable:$true] %s1958_s14 }
  0x16   : > { %s1960_s29 = scalar_lea.hbm %s1959_s14, 128  ;;  %s1965_s15 = scalar_lea.hbm %s2941_s0, 256 }
  0x17   : > { %p1961_p2 = scmp.ne.s32.totalorder %s1959_s14, %s1960_s29  ;;  %p1966_p5 = scmp.lt.s32.totalorder %s1959_s14, %s2941_s0 }
  0x18   : > { %p1967_p8 = scmp.lt.s32.totalorder %s1965_s15, %s1960_s29 }
  0x19   : > { %p1963_p4 = pnand %p1962_p3, %p1961_p2 }
  0x1a   : > { %p1968_p10 = por %p1967_p8, %p1966_p5 }
  0x1b   : > { %p1964_p7 = pneg %p1963_p4 }
  0x1d   : > { %p1969_p9 = pnand %p1968_p10, %p1964_p7 }
  0x1f   : > { %1972 = shalt.err (!%p1969_p9)
}
  0x20   : > { %s2056_s19 = smov 256   ;;  %s2057_s24 = smov 16  }
  0x21   : > { %1807 = dma.hbm_to_vmem [thread:$0]  (!%p2231_p13), %s273_s25, 2048, %s275_s10, %s263_s13, %s2056_s19, %s2056_s19, %s2057_s24  }
  0x22   : > { %p283_p2 = pnand %p1732_p0, %p282_p1 }
  0x23   : > { %s2252_s26 = sand.u32 (!%p283_p2), 1, %s2046_s28  }
  0x24   : > { %286 = sbr.rel (%p283_p2) target bundleno = 820 (0x334), region = 52  ;;  %s2951_s29 = sshll.u32 (!%p283_p2), %s2252_s26, 7 }
  0x25   : > { %s289_s14 = scalar_lea.sflag (!%p283_p2), [#allocation4], %s2252_s26  ;;  %s2258_s20 = scalar_lea.vmem (!%p283_p2), [#allocation3], %s2951_s29 }
  0x29   : > { %2033 = dma.done.wait (%p2209_p6), %s289_s14, 2048  }
  0x2a   : > { %2035 = vsyncadd (%p2209_p6), %s289_s14, 4294965248  ;;  %v2058_v0 = vmov 0   ;;  %v2059_v1 = vmov 3   ;;  %v2269_v2 = vld [vmem:[%s2944_s3] sm:$0xf]  ;;  %v339_v3 = vld [vmem:[%s2258_s20 + $0x60] sm:$0xff] }
  0x2b   : > { %1912 = vset.pattern.permute.xlu1 %v2058_v0  ;;  %1911 = vset.pattern.permute.xlu0 %v2058_v0  ;;  %v341_v4 = vld [vmem:[%s2258_s20 + $0x70] sm:$0xff]  ;;  %v340_v6 = vld [vmem:[%s2258_s20 + $0x68] sm:$0xff]  ;;  %v342_v7 = vld [vmem:[%s2258_s20 + $0x78] sm:$0xff]  ;;  %v2060_v24 = vmov 1   ;;  %v2061_v27 = vmov 5   ;;  %v2062_v30 = vmov 4  }
  0x2c   : > { %1915 = vset.pattern.permute.xlu2 %v2059_v1  ;;  %417 = vperm.xlu1 %1912, %v2269_v2   ;;  %v349_v5 = vpack.c.bf16 %v341_v4, %v339_v3  ;;  %v335_v8 = vld [vmem:[%s2258_s20 + $0x40] sm:$0xff]  ;;  %v350_v9 = vpack.c.bf16 %v342_v7, %v340_v6  ;;  %v337_v10 = vld [vmem:[%s2258_s20 + $0x50] sm:$0xff]  ;;  %v336_v11 = vld [vmem:[%s2258_s20 + $0x48] sm:$0xff]  ;;  %vm358_vm0 = vcmask 523264   ;;  %v2063_v32 = vmov 2   ;;  %s2084_s24 = smov 8  }
  0x2d   : > { %517 = vperm.xlu2 %1915, %v2269_v2   ;;  %v338_v12 = vld [vmem:[%s2258_s20 + $0x58] sm:$0xff]  ;;  %v347_v13 = vpack.c.bf16 %v337_v10, %v335_v8  ;;  %v352_v14 = vld [vmem:[%s2943_s2] sm:$0xf]  ;;  %v331_v16 = vld [vmem:[%s2258_s20 + $0x20] sm:$0xff]  ;;  %v2064_v33 = vmov 8   ;;  %v2065_v34 = vmov 6  }
  0x2e   : > { %366 = vmatpush.bf16.msra.mxu0 %v349_v5  ;;  %379 = vmatpush.bf16.msra.mxu1 %v350_v9  ;;  %v348_v15 = vpack.c.bf16 %v338_v12, %v336_v11  ;;  %v333_v17 = vld [vmem:[%s2258_s20 + $0x30] sm:$0xff]  ;;  %v332_v18 = vld [vmem:[%s2258_s20 + $0x28] sm:$0xff]  ;;  %v334_v19 = vld [vmem:[%s2258_s20 + $0x38] sm:$0xff]  ;;  %v2066_v35 = vmov 7   ;;  %v2067_v36 = vmov 10   ;;  %v2068_v37 = vmov 11  }
  0x2f   : > { %355 = vperm.xlu0 %1911, %v352_v14   ;;  %v345_v20 = vpack.c.bf16 %v333_v17, %v331_v16  ;;  %v346_v21 = vpack.c.bf16 %v334_v19, %v332_v18  ;;  %v327_v22 = vld [vmem:[%s2258_s20] sm:$0xff]  ;;  %v329_v23 = vld [vmem:[%s2258_s20 + $0x10] sm:$0xff]  ;;  %v328_v25 = vld [vmem:[%s2258_s20 + $0x8] sm:$0xff]  ;;  %v2069_v38 = vmov 9   ;;  %v2070_v39 = vmov 13   ;;  %s2085_s10 = smov 10  }
  0x30   : > { %v330_v26 = vld [vmem:[%s2258_s20 + $0x18] sm:$0xff]  ;;  %v343_v28 = vpack.c.bf16 %v329_v23, %v327_v22  ;;  %v351_v31 = vld [vmem:[%s2942_s1] sm:$0x3]  ;;  %v2071_v40 = vmov 16   ;;  %v2072_v41 = vmov 12   ;;  %v2073_v42 = vmov 15  }
  0x31   : > { %v344_v29 = vpack.c.bf16 %v330_v26, %v328_v25  ;;  %v2074_v43 = vmov 22   ;;  %v2075_v44 = vmov 14   ;;  %v2076_v45 = vmov 19   ;;  %v1739_v51 = vld [vmem:[%s2946_s5 + $0x3] ss:$8 sm:$0x3] }
  0x32   : > { %367 = vmatpush.bf16.msra.mxu0 %v347_v13  ;;  %380 = vmatpush.bf16.msra.mxu1 %v348_v15  ;;  %v2077_v46 = vmov 17   ;;  %v2078_v47 = vmov 21   ;;  %v2079_v48 = vmov 20   ;;  %v2080_v49 = vmov 24   ;;  %s2955_s16 = smov 18   ;;  %s2087_s19 = smov 1  }
  0x33   : > { %v2081_v50 = vmov 23   ;;  %v2082_v52 = vmov 26   ;;  %v521_v53 = vperm.slane %v1739_v51, 0  ;;  %v522_v54 = vperm.slane %v1739_v51, 1  ;;  %s2088_s12 = smov 9   ;;  %s2089_s15 = smov 2  }
  0x34   : > { %1913 = vset.pattern.permute.xlu1 %v2060_v24  ;;  %v2083_v55 = vmov 25   ;;  %v1741_v60 = vld [vmem:[%s2946_s5 + $0x5] ss:$8 sm:$0x3]  ;;  %vm391_vm1 = vcmask 1043456   ;;  %s2956_s13 = smov 16  }
  0x35   : > { %1917 = vset.pattern.permute.xlu2 %v2061_v27  ;;  %439 = vperm.xlu1 %1913, %v2269_v2   ;;  %v599_v62 = vperm.slane %v1741_v60, 0  ;;  %v600_v63 = vperm.slane %v1741_v60, 1  ;;  %v1744_v7 = vld [vmem:[%s2946_s5 + $0x10] ss:$8 sm:$0x3]  ;;  %s2952_s23 = smov 17  }
  0x36   : > { %595 = vperm.xlu2 %1917, %v2269_v2   ;;  %368 = vmatpush.bf16.msra.mxu0 %v345_v20  ;;  %v716_v8 = vperm.slane %v1744_v7, 0  ;;  %v717_v9 = vperm.slane %v1744_v7, 1  ;;  %v1737_v16 = vld [vmem:[%s2946_s5 + $0x1] ss:$8 sm:$0x3]  ;;  %s2092_s21 = smov 66  }
  0x37   : > { %381 = vmatpush.bf16.msra.mxu1 %v346_v21  ;;  %1916 = vset.pattern.permute.xlu0 %v2062_v30  ;;  %v444_v18 = vperm.slane %v1737_v16, 1  ;;  %v1740_v19 = vld [vmem:[%s2946_s5 + $0x4] ss:$8 sm:$0x3]  ;;  %v443_v20 = vperm.slane %v1737_v16, 0  ;;  %s2093_s14 = smov 65  }
  0x38   : > { %556 = vperm.xlu0 %1916, %v2269_v2   ;;  %v560_v22 = vperm.slane %v1740_v19, 0  ;;  %v561_v23 = vperm.slane %v1740_v19, 1  ;;  %v1738_v27 = vld [vmem:[%s2946_s5 + $0x2] ss:$8 sm:$0x3]  ;;  %s2953_s25 = smov 64  }
  0x39   : > { %v1747_v51 = vld [vmem:[%s2946_s5 + $0x13] ss:$8 sm:$0x3]  ;;  %s2097_s22 = smov 80   ;;  %vm392_vm2 = vcmask 146436   ;;  %vm495_vm4 = vcmask 15360  }
  0x3a   : > { %369 = vmatpush.bf16.msra.mxu0 %v343_v28  ;;  %vm393_vm3 = vmor %vm392_vm2, %vm391_vm1  ;;  %vm612_vm5 = vcmask 80896   ;;  %vm456_vm6 = vcmask 7168   ;;  %vm573_vm7 = vcmask 72704   ;;  %vm534_vm8 = vcmask 64512   ;;  %s2958_s29 = smov 56  }
  0x3b   : > { %382 = vmatpush.bf16.msra.mxu1 %v344_v29  ;;  %vm651_vm9 = vcmask 130048   ;;  %vm406_vm10 = vcmask 1044040   ;;  %vm407_vm11 = vcmask 1047556   ;;  %vm410_vm12 = vcmask 592896  }
  0x3c   : > { %vm408_vm13 = vmor %vm407_vm11, %vm406_vm10  ;;  %vm402_vm14 = vcmask 596992   ;;  %vm690_vm15 = vcmask 138240   ;;  %vm729_vm2 = vcmask 146432   ;;  %vm471_vm10 = vcmask 1039360  }
  0x3d   : > { %1914 = vset.pattern.permute.xlu1 %v2063_v32  ;;  %1735 = vmatmul.msk.bf16.vlgmr.msra.gmra.mxu0 %vm358_vm0, %v351_v31  ;;  %v483_v32 = vperm.slane %v1738_v27, 1  ;;  %vm510_vm11 = vcmask 1031168  }
  0x3e   : > { %1736 = vmatmul.msk.bf16.vlgmr.msra.gmra.mxu1 %vm358_vm0, %v351_v31  ;;  %478 = vperm.xlu1 %1914, %v2269_v2  }
  0x3f   : > { %1920 = vset.pattern.permute.xlu2 %v2064_v33 }
  0x40   : > { %1918 = vset.pattern.permute.xlu0 %v2065_v34  ;;  %712 = vperm.xlu2 %1920, %v2269_v2   ;;  %v1742_v34 = vld [vmem:[%s2946_s5 + $0x6] ss:$8 sm:$0x3] }
  0x41   : > { %634 = vperm.xlu0 %1918, %v2269_v2  }
  0x46   : > { %1919 = vset.pattern.permute.xlu1 %v2066_v35  ;;  %v482_v35 = vperm.slane %v1738_v27, 0 }
  0x47   : > { %673 = vperm.xlu1 %1919, %v2269_v2  }
  0x48   : > { %1922 = vset.pattern.permute.xlu2 %v2067_v36 }
  0x49   : > { %1923 = vset.pattern.permute.xlu0 %v2068_v37  ;;  %788 = vperm.xlu2 %1922, %v2269_v2  }
  0x4a   : > { %827 = vperm.xlu0 %1923, %v2269_v2  }
  0x4f   : > { %1921 = vset.pattern.permute.xlu1 %v2069_v38  ;;  %v638_v38 = vperm.slane %v1742_v34, 0 }
  0x50   : > { %751 = vperm.xlu1 %1921, %v2269_v2  }
  0x51   : > { %1925 = vset.pattern.permute.xlu2 %v2070_v39  ;;  %v639_v39 = vperm.slane %v1742_v34, 1 }
  0x52   : > { %905 = vperm.xlu2 %1925, %v2269_v2   ;;  %1928 = vset.pattern.permute.xlu0 %v2071_v40 }
  0x53   : > { %1021 = vperm.xlu0 %1928, %v2269_v2  }
  0x58   : > { %1924 = vset.pattern.permute.xlu1 %v2072_v41 }
  0x59   : > { %866 = vperm.xlu1 %1924, %v2269_v2  }
  0x5a   : > { %1927 = vset.pattern.permute.xlu2 %v2073_v42 }
  0x5b   : > { %982 = vperm.xlu2 %1927, %v2269_v2   ;;  %1933 = vset.pattern.permute.xlu0 %v2074_v43  ;;  %v1743_v43 = vld [vmem:[%s2946_s5 + $0x7] ss:$8 sm:$0x3] }
  0x5c   : > { %1233 = vperm.xlu0 %1933, %v2269_v2  }
  0x61   : > { %1926 = vset.pattern.permute.xlu1 %v2075_v44 }
  0x62   : > { %943 = vperm.xlu1 %1926, %v2269_v2  }
  0x63   : > { %1930 = vset.pattern.permute.xlu2 %v2076_v45 }
  0x64   : > { %1122 = vperm.xlu2 %1930, %v2269_v2  }
  0x6a   : > { %1929 = vset.pattern.permute.xlu1 %v2077_v46 }
  0x6b   : > { %1060 = vperm.xlu1 %1929, %v2269_v2  }
  0x6c   : > { %1932 = vset.pattern.permute.xlu2 %v2078_v47 }
  0x6d   : > { %1196 = vperm.xlu2 %1932, %v2269_v2  }
  0x73   : > { %1931 = vset.pattern.permute.xlu1 %v2079_v48 }
  0x74   : > { %1159 = vperm.xlu1 %1931, %v2269_v2  }
  0x75   : > { %1935 = vset.pattern.permute.xlu2 %v2080_v49  ;;  %v678_v49 = vperm.slane %v1743_v43, 1 }
  0x76   : > { %1307 = vperm.xlu2 %1935, %v2269_v2  }
  0x7c   : > { %1934 = vset.pattern.permute.xlu1 %v2081_v50 }
  0x7d   : > { %1270 = vperm.xlu1 %1934, %v2269_v2  }
  0x7e   : > { %1937 = vset.pattern.permute.xlu2 %v2082_v52  ;;  %v1746_v52 = vld [vmem:[%s2946_s5 + $0x12] ss:$8 sm:$0x3] }
  0x7f   : > { %1381 = vperm.xlu2 %1937, %v2269_v2   ;;  %v793_v60 = vperm.slane %v1746_v52, 1 }
  0x85   : > { %1936 = vset.pattern.permute.xlu1 %v2083_v55 }
  0x86   : > { %1344 = vperm.xlu1 %1936, %v2269_v2  }
  0x87   : > { %v518_v56 = vpop.permute.xlu2 %517  ;;  %1939 = vset.pattern.permute.xlu2 %v2058_v0 }
  0x88   : > { %v525_v57 = vmul.f32 %v521_v53, %v518_v56  ;;  %v526_v58 = vmul.f32 %v522_v54, %v518_v56  ;;  %v677_v53 = vperm.slane %v1743_v43, 0  ;;  %v831_v56 = vperm.slane %v1747_v51, 0 }
  0x8a   : > { %v529_v59 = vrot.slane %v526_v58, 4 }
  0x8c   : > { %v530_v61 = vsel %vm391_vm1, %v525_v57, %v529_v59  ;;  %v832_v57 = vperm.slane %v1747_v51, 1 }
  0x8d   : > { %531 = vrot.lane.b32.xlu0 %v530_v61, %s2084_s24 }
  0x8e   : > { %1941 = vset.pattern.permute.xlu1 %v2058_v0 }
  0x90   : > { %v596_v1 = vpop.permute.xlu2 %595 }
  0x91   : > { %v603_v3 = vmul.f32 %v599_v62, %v596_v1  ;;  %v604_v4 = vmul.f32 %v600_v63, %v596_v1  ;;  %v1745_v1 = vld [vmem:[%s2946_s5 + $0x11] ss:$8 sm:$0x3] }
  0x93   : > { %v607_v5 = vrot.slane %v604_v4, 4 }
  0x95   : > { %v608_v6 = vsel %vm391_vm1, %v603_v3, %v607_v5 }
  0x96   : > { %609 = vrot.lane.b32.xlu0 %v608_v6, %s2085_s10  ;;  %v792_v6 = vperm.slane %v1746_v52, 0 }
  0x9a   : > { %v713_v10 = vpop.permute.xlu2 %712 }
  0x9b   : > { %v720_v11 = vmul.f32 %v716_v8, %v713_v10  ;;  %v721_v12 = vmul.f32 %v717_v9, %v713_v10  ;;  %v756_v9 = vperm.slane %v1745_v1, 1  ;;  %v1749_v10 = vld [vmem:[%s2946_s5 + $0x15] ss:$8 sm:$0x3] }
  0x9c   : > { %v909_v27 = vperm.slane %v1749_v10, 0 }
  0x9d   : > { %v724_v13 = vrot.slane %v721_v12, 4 }
  0x9e   : > { %v2336_v14 = vpop.permute.xlu1 %417 }
  0x9f   : > { %v725_v15 = vsel %vm391_vm1, %v720_v11, %v724_v13  ;;  %v755_v13 = vperm.slane %v1745_v1, 0 }
  0xa0   : > { %726 = vrot.lane.b32.xlu0 %v725_v15, %s2955_s16  ;;  %s2098_s16 = smov 74  }
  0xa1   : > { %v2343_v17 = vpop.permute.xlu0 %355 }
  0xa3   : > { %v789_v48 = vpop.permute.xlu2 %788 }
  0xa4   : > { %v797_v7 = vmul.f32 %v793_v60, %v789_v48  ;;  %v796_v16 = vmul.f32 %v792_v6, %v789_v48  ;;  %v1758_v6 = vld [vmem:[%s2946_s5 + $0x26] ss:$8 sm:$0x3] }
  0xa7   : > { %v440_v21 = vpop.permute.xlu1 %439 }
  0xa8   : > { %v448_v24 = vmul.f32 %v444_v18, %v440_v21  ;;  %v447_v25 = vmul.f32 %v443_v20, %v440_v21  ;;  %v800_v18 = vrot.slane %v797_v7, 4  ;;  %v910_v20 = vperm.slane %v1749_v10, 1 }
  0xaa   : > { %v451_v26 = vrot.slane %v448_v24, 4  ;;  %v557_v28 = vpop.permute.xlu0 %556 }
  0xab   : > { %v564_v29 = vmul.f32 %v560_v22, %v557_v28  ;;  %v565_v30 = vmul.f32 %v561_v23, %v557_v28 }
  0xac   : > { %v452_v31 = vsel %vm391_vm1, %v447_v25, %v451_v26  ;;  %v906_v11 = vpop.permute.xlu2 %905  ;;  %v1748_v26 = vld [vmem:[%s2946_s5 + $0x14] ss:$8 sm:$0x3] }
  0xad   : > { %453 = vrot.lane.b32.xlu2 %v452_v31, %s2087_s19  ;;  %v568_v33 = vrot.slane %v565_v30, 4  ;;  %v914_v28 = vmul.f32 %v910_v20, %v906_v11  ;;  %v871_v31 = vperm.slane %v1748_v26, 1  ;;  %v913_v34 = vmul.f32 %v909_v27, %v906_v11 }
  0xae   : > { %v2100_v27 = vmov 18  }
  0xaf   : > { %v569_v36 = vsel %vm391_vm1, %v564_v29, %v568_v33  ;;  %v801_v29 = vsel %vm391_vm1, %v796_v16, %v800_v18  ;;  %1938 = vset.pattern.permute.xlu0 %v2100_v27 }
  0xb0   : > { %v479_v37 = vpop.permute.xlu1 %478  ;;  %570 = vrot.lane.b32.xlu1 %v569_v36, %s2088_s12  ;;  %v870_v36 = vperm.slane %v1748_v26, 0 }
  0xb1   : > { %v487_v40 = vmul.f32 %v483_v32, %v479_v37  ;;  %v486_v41 = vmul.f32 %v482_v35, %v479_v37  ;;  %v1751_v32 = vld [vmem:[%s2946_s5 + $0x17] ss:$8 sm:$0x3]  ;;  %v917_v35 = vrot.slane %v914_v28, 4 }
  0xb3   : > { %v490_v42 = vrot.slane %v487_v40, 4  ;;  %v635_v44 = vpop.permute.xlu0 %634  ;;  %v1752_v40 = vld [vmem:[%s2946_s5 + $0x20] ss:$8 sm:$0x3]  ;;  %v918_v43 = vsel %vm391_vm1, %v913_v34, %v917_v35 }
  0xb4   : > { %v642_v45 = vmul.f32 %v638_v38, %v635_v44  ;;  %v643_v46 = vmul.f32 %v639_v39, %v635_v44  ;;  %v987_v39 = vperm.slane %v1751_v32, 1  ;;  %v1750_v44 = vld [vmem:[%s2946_s5 + $0x16] ss:$8 sm:$0x3] }
  0xb5   : > { %v491_v47 = vsel %vm391_vm1, %v486_v41, %v490_v42  ;;  %v983_v33 = vpop.permute.xlu2 %982  ;;  %v947_v52 = vperm.slane %v1750_v44, 0 }
  0xb6   : > { %492 = vrot.lane.b32.xlu2 %v491_v47, %s2089_s15  ;;  %v646_v50 = vrot.slane %v643_v46, 4  ;;  %v986_v46 = vperm.slane %v1751_v32, 0  ;;  %v991_v47 = vmul.f32 %v987_v39, %v983_v33 }
  0xb8   : > { %v647_v54 = vsel %vm391_vm1, %v642_v45, %v646_v50  ;;  %v1026_v45 = vperm.slane %v1752_v40, 1  ;;  %v1755_v50 = vld [vmem:[%s2946_s5 + $0x23] ss:$8 sm:$0x3] }
  0xb9   : > { %v674_v55 = vpop.permute.xlu1 %673  ;;  %648 = vrot.lane.b32.xlu1 %v647_v54, %s2956_s13  ;;  %v1025_v54 = vperm.slane %v1752_v40, 0  ;;  %v1127_v60 = vperm.slane %v1755_v50, 1  ;;  %v1126_v7 = vperm.slane %v1755_v50, 0 }
  0xba   : > { %v682_v58 = vmul.f32 %v678_v49, %v674_v55  ;;  %v2371_v59 = vpop.f32.mrf.mxu0  ;;  %v681_v62 = vmul.f32 %v677_v53, %v674_v55  ;;  %v948_v49 = vperm.slane %v1750_v44, 1 }
  0xbb   : > { %v2373_v61 = vpop.f32.mrf.mxu1 }
  0xbc   : > { %v685_v63 = vrot.slane %v682_v58, 4  ;;  %v828_v3 = vpop.permute.xlu0 %827 }
  0xbd   : > { %v835_v4 = vmul.f32 %v831_v56, %v828_v3  ;;  %v836_v5 = vmul.f32 %v832_v57, %v828_v3  ;;  %v990_v56 = vmul.f32 %v986_v46, %v983_v33  ;;  %v994_v57 = vrot.slane %v991_v47, 4 }
  0xbe   : > { %v686_v8 = vsel %vm391_vm1, %v681_v62, %v685_v63  ;;  %v1123_v53 = vpop.permute.xlu2 %1122  ;;  %v1753_v63 = vld [vmem:[%s2946_s5 + $0x21] ss:$8 sm:$0x3] }
  0xbf   : > { %687 = vrot.lane.b32.xlu2 %v686_v8, %s2952_s23  ;;  %v839_v12 = vrot.slane %v836_v5, 4  ;;  %s2095_s23 = smov 73   ;;  %v1131_v8 = vmul.f32 %v1127_v60, %v1123_v53  ;;  %v1065_v11 = vperm.slane %v1753_v63, 1  ;;  %v1130_v18 = vmul.f32 %v1126_v7, %v1123_v53  ;;  %v1761_v7 = vld [vmem:[%s2946_s5 + $0x31] ss:$8 sm:$0x3] }
  0xc0   : > { %v1064_v20 = vperm.slane %v1753_v63, 0 }
  0xc1   : > { %v840_v15 = vsel %vm391_vm1, %v835_v4, %v839_v12  ;;  %v1238_v12 = vperm.slane %v1758_v6, 1 }
  0xc2   : > { %v752_v19 = vpop.permute.xlu1 %751  ;;  %841 = vrot.lane.b32.xlu0 %v840_v15, %s2092_s21  ;;  %v373_v21 = vpop.f32.mrf.mxu0  ;;  %s2096_s21 = smov 72  }
  0xc3   : > { %v760_v22 = vmul.f32 %v756_v9, %v752_v19  ;;  %v386_v23 = vpop.f32.mrf.mxu1  ;;  %v759_v24 = vmul.f32 %v755_v13, %v752_v19  ;;  %v995_v9 = vsel %vm391_vm1, %v990_v56, %v994_v57  ;;  %v1757_v13 = vld [vmem:[%s2946_s5 + $0x25] ss:$8 sm:$0x3]  ;;  %v1134_v19 = vrot.slane %v1131_v8, 4 }
  0xc4   : > { %v1200_v32 = vperm.slane %v1757_v13, 0  ;;  %v1762_v56 = vld [vmem:[%s2946_s5 + $0x32] ss:$8 sm:$0x3]  ;;  %v385_v57 = vadd.f32 %v2373_v61, %v2343_v17  ;;  %v372_v61 = vadd.f32 %v2371_v59, %v2343_v17 }
  0xc5   : > { %v763_v25 = vrot.slane %v760_v22, 4  ;;  %v1022_v51 = vpop.permute.xlu0 %1021  ;;  %v1386_v63 = vperm.slane %v1762_v56, 1 }
  0xc6   : > { %v1030_v55 = vmul.f32 %v1026_v45, %v1022_v51  ;;  %v1029_v4 = vmul.f32 %v1025_v54, %v1022_v51 }
  0xc7   : > { %802 = vrot.lane.b32.xlu2 %v801_v29, %s2093_s14  ;;  %v764_v30 = vsel %vm391_vm1, %v759_v24, %v763_v25  ;;  %v1197_v22 = vpop.permute.xlu2 %1196  ;;  %v1201_v24 = vperm.slane %v1757_v13, 1  ;;  %v1237_v25 = vperm.slane %v1758_v6, 0  ;;  %v1349_v13 = vperm.slane %v1761_v7, 1  ;;  %s2106_s14 = smov 119  }
  0xc8   : > { %765 = vrot.lane.b32.xlu1 %v764_v30, %s2953_s25  ;;  %v1033_v5 = vrot.slane %v1030_v55, 4  ;;  %v1135_v30 = vsel %vm391_vm1, %v1130_v18, %v1134_v19  ;;  %v1204_v40 = vmul.f32 %v1200_v32, %v1197_v22  ;;  %v388_v19 = vmax.f32 %v372_v61, 0.0  ;;  %s2105_s25 = smov 127  }
  0xc9   : > { %v1205_v33 = vmul.f32 %v1201_v24, %v1197_v22 }
  0xca   : > { %v1034_v16 = vsel %vm391_vm1, %v1029_v4, %v1033_v5  ;;  %v389_v4 = vmax.f32 %v385_v57, 0.0 }
  0xcb   : > { %v867_v37 = vpop.permute.xlu1 %866 }
  0xcc   : > { %v875_v38 = vmul.f32 %v871_v31, %v867_v37  ;;  %v874_v41 = vmul.f32 %v870_v36, %v867_v37  ;;  %v1756_v31 = vld [vmem:[%s2946_s5 + $0x24] ss:$8 sm:$0x3]  ;;  %v1760_v37 = vld [vmem:[%s2946_s5 + $0x30] ss:$8 sm:$0x3] }
  0xcd   : > { %v1164_v39 = vperm.slane %v1756_v31, 1  ;;  %v1311_v50 = vperm.slane %v1760_v37, 0 }
  0xce   : > { %v878_v42 = vrot.slane %v875_v38, 4  ;;  %v1234_v15 = vpop.permute.xlu0 %1233  ;;  %v1163_v38 = vperm.slane %v1756_v31, 0  ;;  %v2102_v31 = vmov 0.0  }
  0xcf   : > { %919 = vrot.lane.b32.xlu2 %v918_v43, %s2095_s23  ;;  %v1242_v26 = vmul.f32 %v1238_v12, %v1234_v15  ;;  %v1241_v35 = vmul.f32 %v1237_v25, %v1234_v15  ;;  %v1348_v12 = vperm.slane %v1761_v7, 0  ;;  %v397_v15 = vrot.slane %v389_v4, 4  ;;  %394 = vst.msk [vmem:[#allocation2 + $0x8] sm:$0xff] %vm393_vm3, %v2102_v31 }
  0xd0   : > { %v879_v48 = vsel %vm391_vm1, %v874_v41, %v878_v42  ;;  %v1208_v41 = vrot.slane %v1205_v33, 4  ;;  %v1312_v42 = vperm.slane %v1760_v37, 1  ;;  %v1308_v45 = vpop.permute.xlu2 %1307  ;;  %390 = vst [vmem:[#allocation2] sm:$0xff] %v2102_v31  ;;  %vm805_vm3 = vcmask 531456  }
  0xd1   : > { %880 = vrot.lane.b32.xlu1 %v879_v48, %s2096_s21  ;;  %s2099_s21 = smov 81   ;;  %v1245_v36 = vrot.slane %v1242_v26, 4 }
  0xd2   : > { %v1316_v51 = vmul.f32 %v1312_v42, %v1308_v45 }
  0xd3   : > { %v1246_v44 = vsel %vm391_vm1, %v1241_v35, %v1245_v36 }
  0xd4   : > { %v944_v58 = vpop.permute.xlu1 %943  ;;  %v1319_v60 = vrot.slane %v1316_v51, 4 }
  0xd5   : > { %v952_v62 = vmul.f32 %v948_v49, %v944_v58  ;;  %v951_v1 = vmul.f32 %v947_v52, %v944_v58  ;;  %v1759_v49 = vld [vmem:[%s2946_s5 + $0x27] ss:$8 sm:$0x3]  ;;  %v1209_v52 = vsel %vm391_vm1, %v1204_v40, %v1208_v41  ;;  %v1315_v58 = vmul.f32 %v1311_v50, %v1308_v45 }
  0xd6   : > { %v1274_v54 = vperm.slane %v1759_v49, 0  ;;  %v1275_v55 = vperm.slane %v1759_v49, 1  ;;  %v2486_v40 = vld [vmem:[#allocation2 + $0xc] sm:$0xf] }
  0xd7   : > { %v955_v3 = vrot.slane %v952_v62, 4  ;;  %1035 = vrot.lane.b32.xlu2 %v1034_v16, %s2099_s21  ;;  %v1320_v5 = vsel %vm391_vm1, %v1315_v58, %v1319_v60  ;;  %s2108_s21 = smov 112  }
  0xd9   : > { %996 = vrot.lane.b32.xlu1 %v995_v9, %s2097_s22  ;;  %v956_v10 = vsel %vm391_vm1, %v951_v1, %v955_v3  ;;  %s2101_s22 = smov 82   ;;  %v1382_v8 = vpop.permute.xlu2 %1381  ;;  %v1385_v9 = vperm.slane %v1762_v56, 0 }
  0xda   : > { %957 = vrot.lane.b32.xlu0 %v956_v10, %s2098_s16  ;;  %v1390_v10 = vmul.f32 %v1386_v63, %v1382_v8  ;;  %s2112_s16 = smov 110  }
  0xdb   : > { %v1389_v16 = vmul.f32 %v1385_v9, %v1382_v8  ;;  %v413_v9 = vld [vmem:[%s2946_s5] ss:$8 sm:$0x3] }
  0xdc   : > { %v1393_v18 = vrot.slane %v1390_v10, 4  ;;  %v422_v10 = vperm.slane %v413_v9, 1 }
  0xdd   : > { %v1061_v21 = vpop.permute.xlu1 %1060 }
  0xde   : > { %v1069_v23 = vmul.f32 %v1065_v11, %v1061_v21  ;;  %v1068_v28 = vmul.f32 %v1064_v20, %v1061_v21  ;;  %v1394_v17 = vsel %vm391_vm1, %v1389_v16, %v1393_v18 }
  0xe0   : > { %v1072_v29 = vrot.slane %v1069_v23, 4  ;;  %v398_v23 = vsel %vm391_vm1, %v388_v19, %v397_v15  ;;  %v426_v19 = vmul.f32 %v422_v10, %v2336_v14 }
  0xe1   : > { %1136 = vrot.lane.b32.xlu1 %v1135_v30, %s2087_s19  ;;  %s2961_s19 = smov 120  }
  0xe2   : > { %v1073_v34 = vsel %vm391_vm1, %v1068_v28, %v1072_v29 }
  0xe3   : > { %1074 = vrot.lane.b32.xlu0 %v1073_v34, %s2101_s22  ;;  %s2970_s22 = smov 17  }
  0xe6   : > { %v1160_v43 = vpop.permute.xlu1 %1159 }
  0xe7   : > { %v1167_v46 = vmul.f32 %v1163_v38, %v1160_v43  ;;  %v1168_v47 = vmul.f32 %v1164_v39, %v1160_v43 }
  0xe9   : > { %v1171_v48 = vrot.slane %v1168_v47, 4  ;;  %1247 = vrot.lane.b32.xlu1 %v1246_v44, %s2088_s12  ;;  %s2110_s12 = smov 63  }
  0xeb   : > { %1210 = vrot.lane.b32.xlu0 %v1209_v52, %s2084_s24  ;;  %v1172_v53 = vsel %vm391_vm1, %v1167_v46, %v1171_v48  ;;  %s2109_s24 = smov 111  }
  0xec   : > { %1173 = vrot.lane.b32.xlu2 %v1172_v53, %s2089_s15  ;;  %s2969_s15 = smov 18  }
  0xef   : > { %v1271_v62 = vpop.permute.xlu1 %1270 }
  0xf0   : > { %v1278_v1 = vmul.f32 %v1274_v54, %v1271_v62  ;;  %v1279_v3 = vmul.f32 %v1275_v55, %v1271_v62 }
  0xf2   : > { %v1282_v6 = vrot.slane %v1279_v3, 4 }
  0xf3   : > { %1321 = vrot.lane.b32.xlu0 %v1320_v5, %s2956_s13  ;;  %s2959_s13 = smov 47  }
  0xf4   : > { %v1283_v11 = vsel %vm391_vm1, %v1278_v1, %v1282_v6 }
  0xf5   : > { %1284 = vrot.lane.b32.xlu2 %v1283_v11, %s2085_s10  ;;  %s2103_s10 = smov 126  }
  0xf8   : > { %v1345_v20 = vpop.permute.xlu1 %1344 }
  0xf9   : > { %v1352_v21 = vmul.f32 %v1348_v12, %v1345_v20  ;;  %v1353_v22 = vmul.f32 %v1349_v13, %v1345_v20  ;;  %v421_v20 = vperm.slane %v413_v9, 0 }
  0xfb   : > { %399 = vrot.lane.b32.xlu0 %v398_v23, %s2095_s23  ;;  %v1356_v24 = vrot.slane %v1353_v22, 4  ;;  %s2104_s23 = smov 118  }
  0xfd   : > { %v1357_v59 = vsel %vm391_vm1, %v1352_v21, %v1356_v24  ;;  %1395 = vrot.lane.b32.xlu2 %v1394_v17, %s2969_s15  ;;  %v429_v21 = vrot.slane %v426_v19, 4  ;;  %v425_v17 = vmul.f32 %v421_v20, %v2336_v14  ;;  %s2971_s15 = smov 64  }
  0xfe   : > { %1358 = vrot.lane.b32.xlu1 %v1357_v59, %s2970_s22  ;;  %s2957_s22 = smov 55  }
  0xff   : > { %v2465_v29 = vpop.permute.xlu0 %531 }
 0x100   : > { %v533_v12 = vrot.slane %v2465_v29, 4 }
 0x103   : > { %1100 = vperm.xlu0 %1938, %v2269_v2  }
 0x107   : > { %v2457_v25 = vpop.permute.xlu2 %453 }
 0x108   : > { %v455_v61 = vrot.slane %v2457_v25, 4 }
 0x10a   : > { %v457_v20 = vsel %vm456_vm6, %v455_v61, %v2457_v25 }
 0x10b   : > { %1940 = vset.pattern.permute.xlu0 %v2058_v0  ;;  %v2472_v0 = vpop.permute.xlu0 %609 }
 0x110   : > { %v2459_v26 = vpop.permute.xlu2 %492 }
 0x111   : > { %v494_v11 = vrot.slane %v2459_v26, 4 }
 0x113   : > { %v2478_v34 = vpop.permute.xlu0 %726 }
 0x119   : > { %v2461_v27 = vpop.permute.xlu2 %687 }
 0x11a   : > { %v689_v22 = vrot.slane %v2461_v27, 4 }
 0x11c   : > { %v691_v25 = vsel %vm690_vm15, %v689_v22, %v2461_v27 }
 0x121   : > { %v2467_v30 = vpop.permute.xlu2 %802 }
 0x122   : > { %v2463_v28 = vpop.permute.xlu1 %570 }
 0x123   : > { %v572_v23 = vrot.slane %v2463_v28, 4 }
 0x129   : > { %v2474_v32 = vpop.permute.xlu2 %919 }
 0x12b   : > { %v2470_v2 = vpop.permute.xlu1 %648 }
 0x12c   : > { %v650_v24 = vrot.slane %v2470_v2, 4 }
 0x131   : > { %v2480_v35 = vpop.permute.xlu2 %1035 }
 0x134   : > { %v2484_v37 = vpop.permute.xlu0 %841 }
 0x13a   : > { %v2476_v33 = vpop.permute.xlu1 %765 }
 0x143   : > { %v2482_v36 = vpop.permute.xlu1 %880 }
 0x146   : > { %v1174_v38 = vpop.permute.xlu2 %1173 }
 0x147   : > { %v1175_v39 = vrot.slane %v1174_v38, 4 }
 0x149   : > { %v2489_v41 = vsel %vm495_vm4, %v1175_v39, %v1174_v38  ;;  %v1180_v42 = vmul.f32 %v1175_v39, %v2486_v40 }
 0x14b   : > { %v2492_v43 = vpop.permute.xlu1 %996  ;;  %1185 = vrot.lane.b32.xlu1 %v1180_v42, %s2103_s10  ;;  %v430_v42 = vsel %vm391_vm1, %v425_v17, %v429_v21 }
 0x14c   : > { %v2495_v44 = vpop.permute.xlu0 %957 }
 0x14d   : > { %v959_v9 = vrot.slane %v2495_v44, 4 }
 0x14f   : > { %v1285_v45 = vpop.permute.xlu2 %1284 }
 0x150   : > { %v1286_v46 = vrot.slane %v1285_v45, 4 }
 0x152   : > { %v2498_v47 = vsel %vm612_vm5, %v1286_v46, %v1285_v45  ;;  %v1291_v48 = vmul.f32 %v1286_v46, %v2486_v40  ;;  %v804_v45 = vrot.slane %v2467_v30, 4  ;;  %v611_v46 = vrot.slane %v2472_v0, 4 }
 0x153   : > { %v1137_v49 = vpop.permute.xlu1 %1136 }
 0x154   : > { %v1138_v50 = vrot.slane %v1137_v49, 4  ;;  %1296 = vrot.lane.b32.xlu1 %v1291_v48, %s2104_s23  ;;  %v767_v48 = vrot.slane %v2476_v33, 4  ;;  %v806_v27 = vsel %vm805_vm3, %v804_v45, %v2467_v30  ;;  %vm744_vm3 = vcmask 900096  }
 0x155   : > { %v2502_v51 = vpop.permute.xlu0 %1074 }
 0x156   : > { %v2505_v52 = vsel %vm456_vm6, %v1138_v50, %v1137_v49  ;;  %v1143_v53 = vmul.f32 %v1138_v50, %v2486_v40  ;;  %v1076_v10 = vrot.slane %v2502_v51, 4  ;;  %vm883_vm6 = vcmask 588800  }
 0x158   : > { %1148 = vrot.lane.b32.xlu2 %v1143_v53, %s2105_s25 }
 0x15b   : > { %v1248_v54 = vpop.permute.xlu1 %1247 }
 0x15c   : > { %v1249_v55 = vrot.slane %v1248_v54, 4 }
 0x15d   : > { %v1211_v56 = vpop.permute.xlu0 %1210 }
 0x15e   : > { %v1212_v57 = vrot.slane %v1211_v56, 4  ;;  %v2510_v58 = vsel %vm573_vm7, %v1249_v55, %v1248_v54  ;;  %v1254_v60 = vmul.f32 %v1249_v55, %v2486_v40  ;;  %v921_v54 = vrot.slane %v2474_v32, 4 }
 0x15f   : > { %v728_v55 = vrot.slane %v2478_v34, 4 }
 0x160   : > { %v2514_v62 = vsel %vm534_vm8, %v1212_v57, %v1211_v56  ;;  %v1217_v63 = vmul.f32 %v1212_v57, %v2486_v40  ;;  %1259 = vrot.lane.b32.xlu2 %v1254_v60, %s2106_s14  ;;  %v882_v56 = vrot.slane %v2482_v36, 4  ;;  %v922_v30 = vsel %vm402_vm14, %v921_v54, %v2474_v32 }
 0x162   : > { %1222 = vrot.lane.b32.xlu0 %v1217_v63, %s2961_s19 }
 0x165   : > { %v1322_v1 = vpop.permute.xlu0 %1321 }
 0x166   : > { %v1323_v3 = vrot.slane %v1322_v1, 4 }
 0x168   : > { %v2520_v4 = vsel %vm651_vm9, %v1323_v3, %v1322_v1  ;;  %v1328_v5 = vmul.f32 %v1323_v3, %v2486_v40  ;;  %v843_v1 = vrot.slane %v2484_v37, 4  ;;  %v1037_v3 = vrot.slane %v2480_v35, 4 }
 0x16a   : > { %1333 = vrot.lane.b32.xlu0 %v1328_v5, %s2108_s21  ;;  %v998_v5 = vrot.slane %v2492_v43, 4 }
 0x16d   : > { %v400_v6 = vpop.permute.xlu0 %399 }
 0x16e   : > { %v401_v7 = vrot.slane %v400_v6, 4 }
 0x170   : > { %v403_v8 = vsel %vm402_vm14, %v401_v7, %v400_v6  ;;  %411 = vst.msk [vmem:[#allocation2 + $0x8] sm:$0xf] %vm410_vm12, %v401_v7  ;;  %vm549_vm12 = vcmask 982016   ;;  %vm627_vm14 = vcmask 965632  }
 0x171   : > { %409 = vst.msk [vmem:[#allocation2] sm:$0xff] %vm408_vm13, %v403_v8  ;;  %vm588_vm13 = vcmask 973824  }
 0x177   : > { %v435_v13 = vld [vmem:[#allocation2 + $0x8] sm:$0xf] }
 0x178   : > { %v539_v15 = vmul.f32 %v533_v12, %v435_v13  ;;  %v500_v16 = vmul.f32 %v494_v11, %v435_v13  ;;  %v461_v18 = vmul.f32 %v455_v61, %v435_v13  ;;  %v2545_v59 = vld [vmem:[#allocation2] sm:$0xff]  ;;  %v695_v31 = vmul.f32 %v689_v22, %v435_v13 }
 0x179   : > { %v578_v38 = vmul.f32 %v572_v23, %v435_v13  ;;  %v656_v39 = vmul.f32 %v650_v24, %v435_v13  ;;  %v2558_v14 = vmul.f32 %v2545_v59, %v430_v42  ;;  %v810_v49 = vmul.f32 %v804_v45, %v435_v13  ;;  %v2667_v32 = vld [vmem:[#allocation2 + $0x4] sm:$0xff] }
 0x17a   : > { %544 = vrot.lane.b32.xlu2 %v539_v15, %s2961_s19  ;;  %505 = vrot.lane.b32.xlu1 %v500_v16, %s2103_s10  ;;  %v617_v50 = vmul.f32 %v611_v46, %v435_v13  ;;  %v772_v53 = vmul.f32 %v767_v48, %v435_v13  ;;  %v926_v57 = vmul.f32 %v921_v54, %v435_v13 }
 0x17b   : > { %466 = vrot.lane.b32.xlu0 %v461_v18, %s2105_s25  ;;  %v734_v60 = vmul.f32 %v728_v55, %v435_v13  ;;  %v888_v63 = vmul.f32 %v882_v56, %v435_v13  ;;  %v1043_v6 = vmul.f32 %v1037_v3, %v435_v13  ;;  %v849_v7 = vmul.f32 %v843_v1, %v435_v13 }
 0x17c   : > { %v1004_v8 = vmul.f32 %v998_v5, %v435_v13  ;;  %v496_v15 = vsel %vm495_vm4, %v494_v11, %v2459_v26  ;;  %v1082_v16 = vmul.f32 %v1076_v10, %v435_v13  ;;  %v965_v18 = vmul.f32 %v959_v9, %v435_v13 }
 0x17d   : > { %v499_v19 = vmul.f32 %v496_v15, %v2545_v59  ;;  %v535_v26 = vsel %vm534_vm8, %v533_v12, %v2465_v29  ;;  %v613_v11 = vsel %vm612_vm5, %v611_v46, %v2472_v0  ;;  %v460_v21 = vmul.f32 %v457_v20, %v2545_v59  ;;  %v1415_v20 = vld [vmem:[%s2945_s4] sm:$0xf] }
 0x17e   : > { %v538_v13 = vmul.f32 %v535_v26, %v2545_v59  ;;  %v616_v17 = vmul.f32 %v613_v11, %v2545_v59  ;;  %v574_v29 = vsel %vm573_vm7, %v572_v23, %v2463_v28  ;;  %v730_v0 = vsel %vm729_vm2, %v728_v55, %v2478_v34 }
 0x17f   : > { %v694_v61 = vmul.f32 %v691_v25, %v2545_v59  ;;  %v577_v12 = vmul.f32 %v574_v29, %v2545_v59  ;;  %vm844_vm4 = vcmask 539648   ;;  %v652_v28 = vsel %vm651_vm9, %v650_v24, %v2470_v2 }
 0x180   : > { %v845_v34 = vsel %vm844_vm4, %v843_v1, %v2484_v37  ;;  %v809_v22 = vmul.f32 %v806_v27, %v2545_v59  ;;  %v655_v23 = vmul.f32 %v652_v28, %v2545_v59  ;;  %vm960_vm5 = vcmask 605184  }
 0x181   : > { %v768_v2 = vsel %vm358_vm0, %v767_v48, %v2476_v33  ;;  %v961_v37 = vsel %vm960_vm5, %v959_v9, %v2495_v44  ;;  %v925_v24 = vmul.f32 %v922_v30, %v2545_v59  ;;  %vm1038_vm7 = vcmask 662528  }
 0x182   : > { %700 = vrot.lane.b32.xlu2 %v695_v31, %s2109_s24  ;;  %583 = vrot.lane.b32.xlu1 %v578_v38, %s2106_s14  ;;  %v733_v31 = vmul.f32 %v730_v0, %v2545_v59  ;;  %v848_v38 = vmul.f32 %v845_v34, %v2545_v59  ;;  %v771_v42 = vmul.f32 %v768_v2, %v2545_v59  ;;  %vm999_vm8 = vcmask 654336  }
 0x183   : > { %661 = vrot.lane.b32.xlu0 %v656_v39, %s2108_s21  ;;  %v2645_v39 = vpop.permute.xlu2 %1395  ;;  %v964_v45 = vmul.f32 %v961_v37, %v2545_v59  ;;  %v884_v33 = vsel %vm883_vm6, %v882_v56, %v2482_v36  ;;  %v1039_v44 = vsel %vm1038_vm7, %v1037_v3, %v2480_v35  ;;  %vm1077_vm9 = vcmask 670720  }
 0x184   : > { %v1042_v48 = vmul.f32 %v1039_v44, %v2545_v59  ;;  %v1000_v35 = vsel %vm999_vm8, %v998_v5, %v2492_v43  ;;  %v1078_v36 = vsel %vm1077_vm9, %v1076_v10, %v2502_v51  ;;  %v1290_v55 = vmul.f32 %v2498_v47, %v2667_v32 }
 0x185   : > { %v1003_v54 = vmul.f32 %v1000_v35, %v2545_v59  ;;  %v1397_v56 = vrot.slane %v2645_v39, 4  ;;  %v1142_v47 = vmul.f32 %v2505_v52, %v2667_v32  ;;  %v1216_v52 = vmul.f32 %v2514_v62, %v2667_v32 }
 0x186   : > { %vm820_vm4 = vcmask 515072   ;;  %vm859_vm5 = vcmask 506880   ;;  %vm898_vm6 = vcmask 457728   ;;  %vm975_vm7 = vcmask 441344  }
 0x187   : > { %v1398_v51 = vsel %vm729_vm2, %v1397_v56, %v2645_v39  ;;  %v1402_v26 = vmul.f32 %v1397_v56, %v2486_v40  ;;  %vm705_vm2 = vcmask 908288   ;;  %vm1014_vm8 = vcmask 392192  }
 0x188   : > { %v1401_v1 = vmul.f32 %v1398_v51, %v2667_v32  ;;  %vm1053_vm9 = vcmask 384000  }
 0x18a   : > { %815 = vrot.lane.b32.xlu2 %v810_v49, %s2110_s12  ;;  %622 = vrot.lane.b32.xlu1 %v617_v50, %s2104_s23  ;;  %v887_v49 = vmul.f32 %v884_v33, %v2545_v59  ;;  %v1179_v50 = vmul.f32 %v2489_v41, %v2667_v32  ;;  %v1081_v41 = vmul.f32 %v1078_v36, %v2545_v59 }
 0x18b   : > { %777 = vrot.lane.b32.xlu0 %v772_v53, %s2971_s15 }
 0x192   : > { %931 = vrot.lane.b32.xlu2 %v926_v57, %s2957_s22  ;;  %739 = vrot.lane.b32.xlu1 %v734_v60, %s2112_s16  ;;  %s2960_s22 = smov 62   ;;  %v1359_v57 = vpop.permute.xlu1 %1358  ;;  %v2697_v60 = vpop.permute.xlu0 %1100 }
 0x193   : > { %893 = vrot.lane.b32.xlu0 %v888_v63, %s2958_s29  ;;  %s2116_s29 = smov 48   ;;  %v1360_v59 = vrot.slane %v1359_v57, 4 }
 0x195   : > { %v1365_v63 = vmul.f32 %v1360_v59, %v2486_v40  ;;  %v1361_v10 = vsel %vm690_vm15, %v1360_v59, %v1359_v57  ;;  %v1447_v40 = vld [vmem:[%s2948_s7 + $0x20] sm:$0xff]  ;;  %vm666_vm15 = vcmask 916480  }
 0x19a   : > { %1048 = vrot.lane.b32.xlu2 %v1043_v6, %s2959_s13  ;;  %854 = vrot.lane.b32.xlu1 %v849_v7, %s2960_s22  ;;  %s2117_s13 = smov 46   ;;  %s2118_s22 = smov 54   ;;  %v1253_v7 = vmul.f32 %v2510_v58, %v2667_v32  ;;  %v1327_v58 = vmul.f32 %v2520_v4, %v2667_v32 }
 0x19b   : > { %1009 = vrot.lane.b32.xlu0 %v1004_v8, %s2116_s29 }
 0x1a2   : > { %1087 = vrot.lane.b32.xlu2 %v1082_v16, %s2117_s13  ;;  %970 = vrot.lane.b32.xlu1 %v965_v18, %s2118_s22  ;;  %v1364_v16 = vmul.f32 %v1361_v10, %v2667_v32 }
 0x1a3   : > { %503 = vrot.lane.b32.xlu0 %v499_v19, %s2103_s10 }
 0x1aa   : > { %542 = vrot.lane.b32.xlu1 %v538_v13, %s2961_s19  ;;  %464 = vrot.lane.b32.xlu2 %v460_v21, %s2105_s25  ;;  %s2972_s19 = smov 62   ;;  %v1445_v21 = vld [vmem:[%s2948_s7 + $0x10] sm:$0xff] }
 0x1ab   : > { %620 = vrot.lane.b32.xlu0 %v616_v17, %s2104_s23 }
 0x1b2   : > { %698 = vrot.lane.b32.xlu1 %v694_v61, %s2109_s24  ;;  %581 = vrot.lane.b32.xlu2 %v577_v12, %s2106_s14  ;;  %v2662_v46 = vpop.permute.xlu2 %1148 }
 0x1b3   : > { %737 = vrot.lane.b32.xlu0 %v733_v31, %s2112_s16  ;;  %v1450_v31 = vld [vmem:[%s2948_s7 + $0x38] sm:$0xff] }
 0x1ba   : > { %813 = vrot.lane.b32.xlu1 %v809_v22, %s2110_s12  ;;  %659 = vrot.lane.b32.xlu2 %v655_v23, %s2108_s21  ;;  %s2974_s12 = smov 47   ;;  %v2681_v53 = vpop.permute.xlu2 %1259 }
 0x1bb   : > { %852 = vrot.lane.b32.xlu0 %v848_v38, %s2972_s19  ;;  %s2973_s19 = smov 55  }
 0x1bd   : > { %v2708_v3 = vpop.permute.xlu1 %1185 }
 0x1c2   : > { %929 = vrot.lane.b32.xlu1 %v925_v24, %s2973_s19  ;;  %775 = vrot.lane.b32.xlu2 %v771_v42, %s2971_s15  ;;  %s2975_s15 = smov 56   ;;  %s1638_s19 = scalar_lea.sflag [#allocation5], %s2252_s26 }
 0x1c3   : > { %968 = vrot.lane.b32.xlu0 %v964_v45, %s2118_s22 }
 0x1c6   : > { %v2723_v8 = vpop.permute.xlu1 %1296 }
 0x1ca   : > { %1046 = vrot.lane.b32.xlu1 %v1042_v48, %s2974_s12  ;;  %891 = vrot.lane.b32.xlu2 %v887_v49, %s2975_s15 }
 0x1cb   : > { %1183 = vrot.lane.b32.xlu0 %v1179_v50, %s2103_s10 }
 0x1d2   : > { %1085 = vrot.lane.b32.xlu1 %v1081_v41, %s2117_s13  ;;  %1007 = vrot.lane.b32.xlu2 %v1003_v54, %s2116_s29  ;;  %s2976_s13 = smov 120  }
 0x1d3   : > { %1294 = vrot.lane.b32.xlu0 %v1290_v55, %s2104_s23  ;;  %s2008_s23 = scalar_lea.hbm %s2949_s8, 256 }
 0x1d4   : > { %v2700_v43 = vpop.permute.xlu2 %544  ;;  %v2712_v5 = vpop.permute.xlu0 %1222 }
 0x1d5   : > { %v547_v35 = vrot.slane %v2700_v43, 4 }
 0x1da   : > { %1146 = vrot.lane.b32.xlu1 %v1142_v47, %s2105_s25  ;;  %1370 = vrot.lane.b32.xlu2 %v1365_v63, %s2109_s24  ;;  %s2977_s25 = sshll.u32 %s2252_s26, 7 }
 0x1db   : > { %1405 = vrot.lane.b32.xlu0 %v1401_v1, %s2112_s16 }
 0x1dc   : > { %v2715_v6 = vpop.permute.xlu2 %700  ;;  %v2728_v15 = vpop.permute.xlu0 %1333 }
 0x1e2   : > { %1257 = vrot.lane.b32.xlu1 %v1253_v7, %s2106_s14  ;;  %1220 = vrot.lane.b32.xlu2 %v1216_v52, %s2976_s13  ;;  %s2874_s14 = scalar_lea.vmem [#allocation6], %s2977_s25 }
 0x1e3   : > { %s1650_s29 = sshll.u32 %s2874_s14, 4  ;;  %s1651_s29 = int_to_ptr.vmem [resolvable:$true] %s1650_s29 }
 0x1e4   : > { %v2725_v9 = vpop.permute.xlu2 %815 }
 0x1ea   : > { %1368 = vrot.lane.b32.xlu1 %v1364_v16, %s2109_s24  ;;  %1331 = vrot.lane.b32.xlu2 %v1327_v58, %s2108_s21  ;;  %s1797_s21 = sshll.u32 %s2187_s9, 7 }
 0x1ec   : > { %v2735_v62 = vpop.permute.xlu2 %931  ;;  %v506_v18 = vpop.permute.xlu1 %505 }
 0x1ed   : > { %v467_v19 = vpop.permute.xlu0 %466  ;;  %v508_v37 = vrot.slane %v506_v18, 4  ;;  %v703_v18 = vrot.slane %v2715_v6, 4 }
 0x1ee   : > { %v469_v23 = vrot.slane %v467_v19, 4 }
 0x1f2   : > { %1407 = vrot.lane.b32.xlu1 %v1402_v26, %s2112_s16  ;;  %1418 = vperm.xlu2 %1939, %v1415_v20   ;;  %s1649_s16 = scalar_lea.hbm %s2949_s8, %s1797_s21 }
 0x1f3   : > { %s1652_s9 = sshll.u32 %s1649_s16, 4  ;;  %s1653_s9 = int_to_ptr.hbm [resolvable:$true] %s1652_s9 }
 0x1f4   : > { %v2742_v11 = vpop.permute.xlu2 %1048  ;;  %v584_v4 = vpop.permute.xlu1 %583  ;;  %s2002_s12 = sshra.s32 %s1653_s9, 4  ;;  %s2003_s12 = int_to_ptr.hbm [resolvable:$true] %s2002_s12 }
 0x1f5   : > { %v662_v13 = vpop.permute.xlu0 %661  ;;  %v586_v36 = vrot.slane %v584_v4, 4  ;;  %s2004_s15 = scalar_lea.hbm %s2003_s12, 128  ;;  %p2009_p0 = scmp.lt.s32.totalorder %s2003_s12, %s2949_s8 }
 0x1f6   : > { %v664_v47 = vrot.slane %v662_v13, 4  ;;  %p2005_p6 = scmp.ne.s32.totalorder %s2003_s12, %s2004_s15  ;;  %p2010_p1 = scmp.lt.s32.totalorder %s2008_s23, %s2004_s15 }
 0x1f8   : > { %p2006_p9 = pnand %p2005_p6, %p2216_p11  ;;  %p2011_p3 = por %p2010_p1, %p2009_p0 }
 0x1fa   : > { %1463 = vperm.xlu2 %1939, %v1445_v21   ;;  %p2007_p13 = pneg %p2006_p9 }
 0x1fc   : > { %v2747_v17 = vpop.permute.xlu2 %1087  ;;  %v623_v25 = vpop.permute.xlu1 %622  ;;  %p2012_p4 = pnand %p2011_p3, %p2007_p13 }
 0x1fd   : > { %v2749_v29 = vpop.permute.xlu0 %777  ;;  %v625_v56 = vrot.slane %v623_v25, 4 }
 0x1fe   : > { %v780_v6 = vrot.slane %v2749_v29, 4 }
 0x202   : > { %1473 = vperm.xlu2 %1939, %v1447_v40  }
 0x204   : > { %v2754_v0 = vpop.permute.xlu1 %739  ;;  %v465_v61 = vpop.permute.xlu2 %464 }
 0x205   : > { %v2756_v12 = vpop.permute.xlu0 %893  ;;  %v468_v22 = vrot.slane %v465_v61, 4  ;;  %v742_v4 = vrot.slane %v2754_v0, 4 }
 0x207   : > { %v470_v38 = vsel %vm391_vm1, %v468_v22, %v469_v23 }
 0x208   : > { %v472_v30 = vsel %vm471_vm10, %v465_v61, %v470_v38 }
 0x209   : > { %v474_v45 = vadd.f32 %v472_v30, %v2558_v14 }
 0x20a   : > { %1488 = vperm.xlu2 %1939, %v1450_v31  }
 0x20c   : > { %v2761_v27 = vpop.permute.xlu1 %854  ;;  %v582_v28 = vpop.permute.xlu2 %581 }
 0x20d   : > { %v2763_v34 = vpop.permute.xlu0 %1009  ;;  %v585_v49 = vrot.slane %v582_v28, 4 }
 0x20f   : > { %v587_v57 = vsel %vm391_vm1, %v585_v49, %v586_v36  ;;  %v896_v36 = vrot.slane %v2756_v12, 4  ;;  %v1754_v12 = vld [vmem:[%s2946_s5 + $0x22] ss:$8 sm:$0x3] }
 0x210   : > { %v589_v7 = vsel %vm588_vm13, %v582_v28, %v587_v57  ;;  %v934_v57 = vrot.slane %v2735_v62, 4  ;;  %v1012_v62 = vrot.slane %v2763_v34, 4 }
 0x214   : > { %v2766_v39 = vpop.permute.xlu1 %970  ;;  %v660_v24 = vpop.permute.xlu2 %659 }
 0x215   : > { %v504_v2 = vpop.permute.xlu0 %503  ;;  %v663_v51 = vrot.slane %v660_v24, 4 }
 0x216   : > { %v507_v42 = vrot.slane %v504_v2, 4 }
 0x217   : > { %v665_v52 = vsel %vm391_vm1, %v663_v51, %v664_v47 }
 0x218   : > { %v509_v33 = vsel %vm391_vm1, %v507_v42, %v508_v37  ;;  %v667_v13 = vsel %vm666_vm15, %v660_v24, %v665_v52  ;;  %v818_v37 = vrot.slane %v2725_v9, 4 }
 0x219   : > { %v511_v44 = vsel %vm510_vm11, %v504_v2, %v509_v33 }
 0x21a   : > { %v513_v48 = vadd.f32 %v511_v44, %v474_v45  ;;  %v857_v45 = vrot.slane %v2761_v27, 4 }
 0x21c   : > { %v543_v50 = vpop.permute.xlu1 %542  ;;  %v776_v63 = vpop.permute.xlu2 %775 }
 0x21d   : > { %v546_v41 = vrot.slane %v543_v50, 4  ;;  %v621_v54 = vpop.permute.xlu0 %620  ;;  %v779_v25 = vrot.slane %v776_v63, 4 }
 0x21e   : > { %v624_v55 = vrot.slane %v621_v54, 4 }
 0x21f   : > { %v548_v14 = vsel %vm391_vm1, %v546_v41, %v547_v35  ;;  %v781_v0 = vsel %vm391_vm1, %v779_v25, %v780_v6 }
 0x220   : > { %v550_v59 = vsel %vm549_vm12, %v543_v50, %v548_v14  ;;  %v626_v43 = vsel %vm391_vm1, %v624_v55, %v625_v56  ;;  %v782_v33 = vsel %vm358_vm0, %v776_v63, %v781_v0  ;;  %vm936_vm0 = vcmask 449536  }
 0x221   : > { %v552_v1 = vadd.f32 %v550_v59, %v513_v48  ;;  %v628_v16 = vsel %vm627_vm14, %v621_v54, %v626_v43  ;;  %v973_v59 = vrot.slane %v2766_v39, 4 }
 0x223   : > { %v591_v10 = vadd.f32 %v589_v7, %v552_v1 }
 0x224   : > { %v699_v58 = vpop.permute.xlu1 %698  ;;  %v892_v23 = vpop.permute.xlu2 %891 }
 0x225   : > { %v630_v19 = vadd.f32 %v628_v16, %v591_v10  ;;  %v702_v20 = vrot.slane %v699_v58, 4  ;;  %v738_v26 = vpop.permute.xlu0 %737  ;;  %v895_v48 = vrot.slane %v892_v23, 4 }
 0x226   : > { %v741_v21 = vrot.slane %v738_v26, 4 }
 0x227   : > { %v669_v40 = vadd.f32 %v667_v13, %v630_v19  ;;  %v704_v61 = vsel %vm391_vm1, %v702_v20, %v703_v18  ;;  %v897_v54 = vsel %vm391_vm1, %v895_v48, %v896_v36  ;;  %v1104_v13 = vperm.slane %v1754_v12, 0 }
 0x228   : > { %v706_v31 = vsel %vm705_vm2, %v699_v58, %v704_v61  ;;  %v743_v28 = vsel %vm391_vm1, %v741_v21, %v742_v4  ;;  %v899_v63 = vsel %vm898_vm6, %v892_v23, %v897_v54  ;;  %v1105_v58 = vperm.slane %v1754_v12, 1 }
 0x229   : > { %v708_v22 = vadd.f32 %v706_v31, %v669_v40  ;;  %v745_v38 = vsel %vm744_vm3, %v738_v26, %v743_v28  ;;  %v1051_v26 = vrot.slane %v2742_v11, 4  ;;  %v1108_v6 = vmul.f32 %v1104_v13, %v2697_v60 }
 0x22a   : > { %v1109_v21 = vmul.f32 %v1105_v58, %v2697_v60  ;;  %v1151_v60 = vrot.slane %v2662_v46, 4 }
 0x22b   : > { %v747_v30 = vadd.f32 %v745_v38, %v708_v22  ;;  %v1090_v38 = vrot.slane %v2747_v17, 4 }
 0x22c   : > { %v814_v2 = vpop.permute.xlu1 %813  ;;  %v1008_v27 = vpop.permute.xlu2 %1007  ;;  %v1112_v22 = vrot.slane %v1109_v21, 4 }
 0x22d   : > { %v817_v24 = vrot.slane %v814_v2, 4  ;;  %v853_v42 = vpop.permute.xlu0 %852  ;;  %v784_v29 = vadd.f32 %v782_v33, %v747_v30  ;;  %v1011_v1 = vrot.slane %v1008_v27, 4 }
 0x22e   : > { %v856_v44 = vrot.slane %v853_v42, 4  ;;  %v1113_v0 = vsel %vm391_vm1, %v1108_v6, %v1112_v22 }
 0x22f   : > { %v819_v49 = vsel %vm391_vm1, %v817_v24, %v818_v37  ;;  %v1013_v39 = vsel %vm391_vm1, %v1011_v1, %v1012_v62 }
 0x230   : > { %v821_v50 = vsel %vm820_vm4, %v814_v2, %v819_v49  ;;  %v858_v35 = vsel %vm391_vm1, %v856_v44, %v857_v45  ;;  %v1015_v25 = vsel %vm1014_vm8, %v1008_v27, %v1013_v39  ;;  %vm1092_vm4 = vcmask 375808  }
 0x231   : > { %v823_v41 = vadd.f32 %v821_v50, %v784_v29  ;;  %v860_v9 = vsel %vm859_vm5, %v853_v42, %v858_v35  ;;  %v1115_v45 = vmul.f32 %v2667_v32, %v1113_v0  ;;  %v1188_v29 = vrot.slane %v2708_v3, 4 }
 0x232   : > { %v1225_v50 = vrot.slane %v2712_v5, 4  ;;  %v1262_v3 = vrot.slane %v2681_v53, 4  ;;  %v2119_v39 = vmov 839922192  }
 0x233   : > { %v862_v55 = vadd.f32 %v860_v9, %v823_v41 }
 0x234   : > { %v930_v56 = vpop.permute.xlu1 %929  ;;  %v1371_v40 = vpop.permute.xlu2 %1370 }
 0x235   : > { %v933_v51 = vrot.slane %v930_v56, 4  ;;  %v969_v14 = vpop.permute.xlu0 %968  ;;  %v901_v43 = vadd.f32 %v899_v63, %v862_v55 }
 0x236   : > { %v972_v47 = vrot.slane %v969_v14, 4 }
 0x237   : > { %v935_v7 = vsel %vm391_vm1, %v933_v51, %v934_v57  ;;  %v1299_v51 = vrot.slane %v2723_v8, 4 }
 0x238   : > { %v937_v52 = vsel %vm936_vm0, %v930_v56, %v935_v7  ;;  %v974_v10 = vsel %vm391_vm1, %v972_v47, %v973_v59  ;;  %v1336_v47 = vrot.slane %v2728_v15, 4  ;;  %v1421_v15 = vunpack.c.l.s4 %v2119_v39 }
 0x239   : > { %v939_v16 = vadd.f32 %v937_v52, %v901_v43  ;;  %v976_v18 = vsel %vm975_vm7, %v969_v14, %v974_v10 }
 0x23b   : > { %v978_v19 = vadd.f32 %v976_v18, %v939_v16  ;;  %v1373_v18 = vrot.slane %v1371_v40, 4 }
 0x23c   : > { %v1047_v20 = vpop.permute.xlu1 %1046  ;;  %v1221_v37 = vpop.permute.xlu2 %1220 }
 0x23d   : > { %v1050_v4 = vrot.slane %v1047_v20, 4  ;;  %v1017_v61 = vadd.f32 %v1015_v25, %v978_v19  ;;  %v1184_v30 = vpop.permute.xlu0 %1183  ;;  %v1224_v17 = vrot.slane %v1221_v37, 4 }
 0x23e   : > { %v1187_v33 = vrot.slane %v1184_v30, 4 }
 0x23f   : > { %v1052_v34 = vsel %vm391_vm1, %v1050_v4, %v1051_v26  ;;  %v1226_v32 = vsel %vm391_vm1, %v1224_v17, %v1225_v50  ;;  %v1422_v26 = vunpack.c.0.s8 %v1421_v15  ;;  %v1796_v17 = vld [vmem:[%s2947_s6 + $0x18] sm:$0xff] }
 0x240   : > { %v1054_v31 = vsel %vm1053_vm9, %v1047_v20, %v1052_v34  ;;  %v1189_v35 = vsel %vm391_vm1, %v1187_v33, %v1188_v29  ;;  %v1227_v57 = vsel %vm549_vm12, %v1221_v37, %v1226_v32  ;;  %v1793_v33 = vld [vmem:[%s2947_s6] sm:$0xff]  ;;  %v1795_v29 = vld [vmem:[%s2947_s6 + $0x10] sm:$0xff]  ;;  %v1942_v32 = vld [vmem:[%s2258_s20] sm:$0xff] }
 0x241   : > { %v1056_v28 = vadd.f32 %v1054_v31, %v1017_v61  ;;  %v1190_v55 = vsel %vm510_vm11, %v1184_v30, %v1189_v35 }
 0x244   : > { %v1086_v23 = vpop.permute.xlu1 %1085  ;;  %v1332_v27 = vpop.permute.xlu2 %1331 }
 0x245   : > { %v1089_v11 = vrot.slane %v1086_v23, 4  ;;  %v1295_v41 = vpop.permute.xlu0 %1294  ;;  %v1335_v14 = vrot.slane %v1332_v27, 4 }
 0x246   : > { %v1298_v46 = vrot.slane %v1295_v41, 4 }
 0x247   : > { %v1091_v2 = vsel %vm391_vm1, %v1089_v11, %v1090_v38  ;;  %v1337_v7 = vsel %vm391_vm1, %v1335_v14, %v1336_v47  ;;  %v1444_v38 = vld [vmem:[%s2948_s7 + $0x8] sm:$0xff]  ;;  %v1446_v11 = vld [vmem:[%s2948_s7 + $0x18] sm:$0xff] }
 0x248   : > { %v1093_v24 = vsel %vm1092_vm4, %v1086_v23, %v1091_v2  ;;  %v1300_v12 = vsel %vm391_vm1, %v1298_v46, %v1299_v51  ;;  %v1338_v62 = vsel %vm666_vm15, %v1332_v27, %v1337_v7  ;;  %1458 = vperm.xlu1 %1941, %v1444_v38   ;;  %v1950_v38 = vld [vmem:[%s2258_s20 + $0x40] sm:$0xff] }
 0x249   : > { %v1095_v42 = vadd.f32 %v1093_v24, %v1056_v28  ;;  %v1301_v53 = vsel %vm627_vm14, %v1295_v41, %v1300_v12 }
 0x24b   : > { %v1116_v44 = vadd.f32 %v1115_v45, %v1095_v42  ;;  %v1794_v45 = vld [vmem:[%s2947_s6 + $0x8] sm:$0xff] }
 0x24c   : > { %v1147_v48 = vpop.permute.xlu1 %1146  ;;  %v1419_v61 = vpop.permute.xlu2 %1418 }
 0x24d   : > { %v1150_v49 = vrot.slane %v1147_v48, 4  ;;  %v1406_v20 = vpop.permute.xlu0 %1405  ;;  %v1423_v34 = vperm.slane %v1419_v61, %v1422_v26 }
 0x24e   : > { %v1409_v21 = vrot.slane %v1406_v20, 4 }
 0x24f   : > { %v1152_v36 = vsel %vm391_vm1, %v1150_v49, %v1151_v60  ;;  %v1448_v60 = vld [vmem:[%s2948_s7 + $0x28] sm:$0xff] }
 0x250   : > { %v1153_v9 = vsel %vm471_vm10, %v1147_v48, %v1152_v36  ;;  %vm1524_vm10 = vcmask 1041408   ;;  %1468 = vperm.xlu1 %1941, %v1446_v11   ;;  %v1449_v48 = vld [vmem:[%s2948_s7 + $0x30] sm:$0xff] }
 0x251   : > { %v1155_v54 = vadd.f32 %v1153_v9, %v1116_v44  ;;  %v1443_v44 = vld [vmem:[%s2948_s7] sm:$0xff] }
 0x252   : > { %1453 = vperm.xlu0 %1940, %v1443_v44  }
 0x253   : > { %v1192_v56 = vadd.f32 %v1190_v55, %v1155_v54  ;;  %v1943_v55 = vld [vmem:[%s2258_s20 + $0x8] sm:$0xff] }
 0x254   : > { %v1258_v5 = vpop.permute.xlu1 %1257 }
 0x255   : > { %v1229_v59 = vadd.f32 %v1227_v57, %v1192_v56  ;;  %v1261_v63 = vrot.slane %v1258_v5, 4  ;;  %v1464_v56 = vpop.permute.xlu2 %1463 }
 0x257   : > { %v1263_v1 = vsel %vm391_vm1, %v1261_v63, %v1262_v3  ;;  %v1944_v63 = vld [vmem:[%s2258_s20 + $0x20] sm:$0xff] }
 0x258   : > { %v1264_v43 = vsel %vm588_vm13, %v1258_v5, %v1263_v1  ;;  %1483 = vperm.xlu1 %1941, %v1449_v48   ;;  %v1952_v48 = vld [vmem:[%s2258_s20 + $0x50] sm:$0xff] }
 0x259   : > { %v1266_v52 = vadd.f32 %v1264_v43, %v1229_v59  ;;  %v1945_v43 = vld [vmem:[%s2258_s20 + $0x28] sm:$0xff] }
 0x25a   : > { %1478 = vperm.xlu0 %1940, %v1448_v60  }
 0x25b   : > { %v1303_v10 = vadd.f32 %v1301_v53, %v1266_v52 }
 0x25c   : > { %v1369_v8 = vpop.permute.xlu1 %1368 }
 0x25d   : > { %v1340_v16 = vadd.f32 %v1338_v62, %v1303_v10  ;;  %v1372_v58 = vrot.slane %v1369_v8, 4  ;;  %v1946_v10 = vld [vmem:[%s2258_s20 + $0x10] sm:$0xff] }
 0x25f   : > { %v1374_v19 = vsel %vm391_vm1, %v1372_v58, %v1373_v18  ;;  %v1947_v58 = vld [vmem:[%s2258_s20 + $0x18] sm:$0xff] }
 0x260   : > { %v1375_v4 = vsel %vm705_vm2, %v1369_v8, %v1374_v19 }
 0x261   : > { %v1377_v31 = vadd.f32 %v1375_v4, %v1340_v16 }
 0x264   : > { %v1408_v13 = vpop.permute.xlu1 %1407 }
 0x265   : > { %v1410_v25 = vrot.slane %v1408_v13, 4  ;;  %v1948_v13 = vld [vmem:[%s2258_s20 + $0x30] sm:$0xff] }
 0x267   : > { %v1411_v28 = vsel %vm391_vm1, %v1409_v21, %v1410_v25  ;;  %vm1511_vm1 = vcmask 31744   ;;  %v1949_v25 = vld [vmem:[%s2258_s20 + $0x38] sm:$0xff] }
 0x268   : > { %v1412_v6 = vsel %vm744_vm3, %v1406_v20, %v1411_v28  ;;  %v1474_v28 = vpop.permute.xlu2 %1473 }
 0x269   : > { %v1414_v22 = vadd.f32 %v1412_v6, %v1377_v31 }
 0x26b   : > { %v1425_v40 = vadd.f32 %v1423_v34, %v1414_v22 }
 0x26d   : > { %v1426_v23 = vmax.f32 %v1425_v40, 0.0 }
 0x26f   : > { %1436 = vst [vmem:[#allocation1] ss:$2 sm:$0xff] %v1426_v23 }
 0x276   : > { %v1437_v0 = vld.sshfl [vmem:[#allocation1] sm:$0xff pattern:$0x75316420]  ;;  %v1438_v30 = vld.sshfl [vmem:[#allocation1 + $0x8] sm:$0xff pattern:$0x75316420] }
 0x277   : > { %v1441_v2 = vpack.c.bf16 %v1437_v0, %v1437_v0  ;;  %v1442_v37 = vpack.c.bf16 %v1438_v30, %v1438_v30  ;;  %v1951_v0 = vld [vmem:[%s2258_s20 + $0x48] sm:$0xff] }
 0x279   : > { %v1526_v24 = vsel %vm1524_vm10, %v1441_v2, 0  ;;  %v1529_v42 = vsel %vm1524_vm10, %v1442_v37, 0 }
 0x27a   : > { %1538 = vmatpush.bf16.msrb.mxu0 %v1526_v24  ;;  %1798 = vmatpush.bf16.msra.mxu2 %v1526_v24 }
 0x27b   : > { %1567 = vmatpush.bf16.msrb.mxu1 %v1529_v42  ;;  %1799 = vmatpush.bf16.msra.mxu3 %v1529_v42 }
 0x27d   : > { %1780 = vmatmul.msk.bf16.vlgmr.msra.gmra.mxu2 %vm1511_vm1, %v1794_v45  ;;  %1779 = vmatmul.msk.bf16.vlgmr.msrb.gmra.mxu0 %vm1511_vm1, %v1793_v33 }
 0x27e   : > { %1784 = vmatmul.msk.bf16.vlgmr.msra.gmra.mxu3 %vm1511_vm1, %v1794_v45  ;;  %1783 = vmatmul.msk.bf16.vlgmr.msrb.gmra.mxu1 %vm1511_vm1, %v1793_v33 }
 0x28d   : > { %1781 = vmatmul.msk.bf16.gmra.mxu2 %vm1511_vm1, %v1795_v29 }
 0x28e   : > { %1785 = vmatmul.msk.bf16.gmra.mxu3 %vm1511_vm1, %v1795_v29  ;;  %v1953_v29 = vld [vmem:[%s2258_s20 + $0x58] sm:$0xff] }
 0x29d   : > { %1782 = vmatmul.msk.bf16.gmra.mxu2 %vm1511_vm1, %v1796_v17 }
 0x29e   : > { %1786 = vmatmul.msk.bf16.gmra.mxu3 %vm1511_vm1, %v1796_v17 }
 0x2ba   : > { %v1459_v41 = vpop.permute.xlu1 %1458 }
 0x2c2   : > { %v1469_v16 = vpop.permute.xlu1 %1468 }
 0x2c4   : > { %v1454_v50 = vpop.permute.xlu0 %1453 }
 0x2cc   : > { %v1479_v24 = vpop.permute.xlu0 %1478 }
 0x2fa   : > { %v1540_v49 = vpop.f32.mrf.mxu0 }
 0x2fb   : > { %v1569_v35 = vpop.f32.mrf.mxu1  ;;  %v1541_v36 = vadd.f32 %v1540_v49, %v1454_v50 }
 0x2fc   : > { %v1570_v9 = vadd.f32 %v1569_v35, %v1454_v50  ;;  %v1484_v35 = vpop.permute.xlu1 %1483 }
 0x2fd   : > { %v1589_v54 = vadd.f32 %v1942_v32, %v1541_v36 }
 0x2fe   : > { %v1590_v27 = vadd.f32 %v1943_v55, %v1570_v9 }
 0x2ff   : > { %v1605_v46 = vmax.f32 %v1589_v54, 0.0  ;;  %v1954_v54 = vld [vmem:[%s2258_s20 + $0x60] sm:$0xff] }
 0x300   : > { %v1545_v3 = vpop.f32.mrf.mxu2  ;;  %v1606_v57 = vmax.f32 %v1590_v27, 0.0  ;;  %v1955_v27 = vld [vmem:[%s2258_s20 + $0x68] sm:$0xff] }
 0x301   : > { %v1546_v5 = vadd.f32 %v1545_v3, %v1464_v56  ;;  %v1574_v51 = vpop.f32.mrf.mxu3  ;;  %1621 = vst [vmem:[%s2874_s14] sm:$0xff] %v1605_v46 }
 0x302   : > { %v1575_v14 = vadd.f32 %v1574_v51, %v1464_v56  ;;  %1622 = vst [vmem:[%s2874_s14 + $0x8] sm:$0xff] %v1606_v57  ;;  %v1542_v59 = vpop.f32.mrf.mxu0  ;;  %v1489_v57 = vpop.permute.xlu2 %1488 }
 0x303   : > { %v1593_v47 = vadd.f32 %v1944_v63, %v1546_v5  ;;  %v1543_v12 = vadd.f32 %v1542_v59, %v1459_v41  ;;  %v1571_v1 = vpop.f32.mrf.mxu1  ;;  %v1956_v63 = vld [vmem:[%s2258_s20 + $0x70] sm:$0xff] }
 0x304   : > { %v1594_v7 = vadd.f32 %v1945_v43, %v1575_v14  ;;  %v1572_v52 = vadd.f32 %v1571_v1, %v1459_v41 }
 0x305   : > { %v1609_v53 = vmax.f32 %v1593_v47, 0.0  ;;  %v1591_v62 = vadd.f32 %v1946_v10, %v1543_v12  ;;  %v1957_v12 = vld [vmem:[%s2258_s20 + $0x78] sm:$0xff] }
 0x306   : > { %v1610_v8 = vmax.f32 %v1594_v7, 0.0  ;;  %v1592_v18 = vadd.f32 %v1947_v58, %v1572_v52 }
 0x307   : > { %1625 = vst [vmem:[%s2874_s14 + $0x20] sm:$0xff] %v1609_v53  ;;  %v1607_v39 = vmax.f32 %v1591_v62, 0.0 }
 0x308   : > { %1626 = vst [vmem:[%s2874_s14 + $0x28] sm:$0xff] %v1610_v8  ;;  %v1547_v15 = vpop.f32.mrf.mxu2  ;;  %v1608_v19 = vmax.f32 %v1592_v18, 0.0 }
 0x309   : > { %v1548_v20 = vadd.f32 %v1547_v15, %v1469_v16  ;;  %v1576_v26 = vpop.f32.mrf.mxu3  ;;  %1623 = vst [vmem:[%s2874_s14 + $0x10] sm:$0xff] %v1607_v39 }
 0x30a   : > { %v1577_v4 = vadd.f32 %v1576_v26, %v1469_v16  ;;  %1624 = vst [vmem:[%s2874_s14 + $0x18] sm:$0xff] %v1608_v19 }
 0x30b   : > { %v1595_v21 = vadd.f32 %v1948_v13, %v1548_v20 }
 0x30c   : > { %v1596_v61 = vadd.f32 %v1949_v25, %v1577_v4 }
 0x30d   : > { %v1611_v34 = vmax.f32 %v1595_v21, 0.0 }
 0x30e   : > { %v1612_v31 = vmax.f32 %v1596_v61, 0.0 }
 0x30f   : > { %1627 = vst [vmem:[%s2874_s14 + $0x30] sm:$0xff] %v1611_v34 }
 0x310   : > { %1628 = vst [vmem:[%s2874_s14 + $0x38] sm:$0xff] %v1612_v31  ;;  %v1550_v6 = vpop.f32.mrf.mxu2 }
 0x311   : > { %v1551_v22 = vadd.f32 %v1550_v6, %v1474_v28  ;;  %v1579_v40 = vpop.f32.mrf.mxu3 }
 0x312   : > { %v1580_v23 = vadd.f32 %v1579_v40, %v1474_v28 }
 0x313   : > { %v1597_v11 = vadd.f32 %v1950_v38, %v1551_v22 }
 0x314   : > { %v1598_v30 = vadd.f32 %v1951_v0, %v1580_v23 }
 0x315   : > { %v1613_v2 = vmax.f32 %v1597_v11, 0.0 }
 0x316   : > { %v1614_v37 = vmax.f32 %v1598_v30, 0.0 }
 0x317   : > { %1629 = vst [vmem:[%s2874_s14 + $0x40] sm:$0xff] %v1613_v2 }
 0x318   : > { %1630 = vst [vmem:[%s2874_s14 + $0x48] sm:$0xff] %v1614_v37  ;;  %v1552_v42 = vpop.f32.mrf.mxu2 }
 0x319   : > { %v1581_v45 = vpop.f32.mrf.mxu3  ;;  %v1553_v33 = vadd.f32 %v1552_v42, %v1479_v24 }
 0x31a   : > { %v1582_v44 = vadd.f32 %v1581_v45, %v1479_v24 }
 0x31b   : > { %v1599_v60 = vadd.f32 %v1952_v48, %v1553_v33 }
 0x31c   : > { %v1600_v17 = vadd.f32 %v1953_v29, %v1582_v44 }
 0x31d   : > { %v1615_v49 = vmax.f32 %v1599_v60, 0.0 }
 0x31e   : > { %v1616_v50 = vmax.f32 %v1600_v17, 0.0 }
 0x31f   : > { %1631 = vst [vmem:[%s2874_s14 + $0x50] sm:$0xff] %v1615_v49 }
 0x320   : > { %1632 = vst [vmem:[%s2874_s14 + $0x58] sm:$0xff] %v1616_v50  ;;  %v1555_v36 = vpop.f32.mrf.mxu2 }
 0x321   : > { %v1556_v41 = vadd.f32 %v1555_v36, %v1484_v35  ;;  %v1584_v9 = vpop.f32.mrf.mxu3 }
 0x322   : > { %v1585_v32 = vadd.f32 %v1584_v9, %v1484_v35 }
 0x323   : > { %v1601_v55 = vadd.f32 %v1954_v54, %v1556_v41 }
 0x324   : > { %v1602_v46 = vadd.f32 %v1955_v27, %v1585_v32 }
 0x325   : > { %v1617_v56 = vmax.f32 %v1601_v55, 0.0 }
 0x326   : > { %v1618_v3 = vmax.f32 %v1602_v46, 0.0 }
 0x327   : > { %1633 = vst [vmem:[%s2874_s14 + $0x60] sm:$0xff] %v1617_v56 }
 0x328   : > { %1634 = vst [vmem:[%s2874_s14 + $0x68] sm:$0xff] %v1618_v3  ;;  %v1557_v5 = vpop.f32.mrf.mxu2 }
 0x329   : > { %v1558_v51 = vadd.f32 %v1557_v5, %v1489_v57  ;;  %v1586_v14 = vpop.f32.mrf.mxu3 }
 0x32a   : > { %v1587_v59 = vadd.f32 %v1586_v14, %v1489_v57 }
 0x32b   : > { %v1603_v47 = vadd.f32 %v1956_v63, %v1558_v51 }
 0x32c   : > { %v1604_v1 = vadd.f32 %v1957_v12, %v1587_v59 }
 0x32d   : > { %v1619_v43 = vmax.f32 %v1603_v47, 0.0 }
 0x32e   : > { %v1620_v7 = vmax.f32 %v1604_v1, 0.0 }
 0x32f   : > { %1635 = vst [vmem:[%s2874_s14 + $0x70] sm:$0xff] %v1619_v43 }
 0x330   : > { %1636 = vst [vmem:[%s2874_s14 + $0x78] sm:$0xff] %v1620_v7 }
 0x331   : > { %2015 = shalt.err (!%p2012_p4)
}
 0x332   : > { %s2120_s26 = smov 256   ;;  %s2978_s14 = smov 16  }
 0x333   : > { %1802 = dma.vmem_to_hbm [thread:$0]  (%p2216_p11), %s1651_s29, 2048, %s1653_s9, %s1638_s19, %s2120_s26, %s2120_s26, %s2978_s14  }
 0x334 PF: > { %s1667_s21 = sand.u32 1, %s2042_s27   ;;  %p2979_p7 = scmp.ge.s32.totalorder %s2054_s30, 2 }
 0x335   : > { %s1668_s24 = scalar_lea.sflag [#allocation5], %s1667_s21 }
 0x336   : > { %p1809_p5 = pnand %p2979_p7, %p2220_p12 }
 0x338   : > { %p1810_p8 = pneg %p1809_p5 }
 0x33a   : > { %2037 = dma.done.wait (%p1810_p8), %s1668_s24, 2048  }
 0x33b   : > { %2039 = vsyncadd (%p1810_p8), %s1668_s24, 4294965248  ;;  %s2980_s22 = sld [smem:[#allocation9_spill]]  ;;  %p21_p10 = scmp.ge.s32.totalorder %s2191_s11, 4  }
 0x33c   : > { %s2981_s29 = sld [smem:[#allocation10_spill]]  ;;  %s2982_s27 = smov %s2046_s28 }
 0x33d   : > { %s2984_s30 = smov %s2191_s11  ;;  %23 = sbr.rel (!%p21_p10) target bundleno = 5 (0x5), region = 123 }
 0x341   : > { %s2983_s28 = smov %s2980_s22 }
 0x342   :  { %1674 = vsyncpa [#allocation4], 1 }
 0x343   :  { %1676 = vsyncpa [#allocation4 + $0x1], 1 }
 0x344   :  { %1677 = vsyncpa [#allocation5], 1 }
 0x345   :  { %1679 = vsyncpa [#allocation5 + $0x1], 1 }

</bundles_post_ra>
